<compile_context>
chip_gen: v5e
topology: v5e:2x2
jax: 0.10.0
libtpu: 0.0.40
codegen_flags: <defaults>
</compile_context>

<pallas_src>
import jax
import jax.numpy as jnp
import numpy as np
from jax import lax
from jax.experimental import pallas as pl
from jax.experimental.pallas import tpu as pltpu


_GATE_PERM = (0, 1, 3, 2)   # reorder LSTM gate blocks (i, f, g, o) -> (i, f, o, g)


def _pack_gates(a_f, a_b, nH):
    """Pack per-gate column blocks of two (..., 4*nH) arrays (gate order i,f,g,o)
    into (..., 8*nH) with column layout [i_f,i_b | f_f,f_b | o_f,o_b | g_f,g_b]."""
    lead = a_f.shape[:-1]
    af = a_f.reshape(lead + (4, nH))[..., _GATE_PERM, :]
    ab = a_b.reshape(lead + (4, nH))[..., _GATE_PERM, :]
    return jnp.stack([af, ab], axis=-2).reshape(lead + (8 * nH,))


def _make_kernel(T, B_pad, nH):
    def kernel(xm_ref, w_ih_ref, b_ref, w_hh_ref, w_emb_ref, b_emb_ref,
               out_ref, xproj_ref):
        # ---- hoisted input projection for the whole sequence, both directions:
        #      one (T*B_pad, 2*nIn) @ (2*nIn, 8H) MXU call.  Row-block t already
        #      contains fwd(t) columns and bwd(T-1-t) columns (block-diag W_ih).
        xproj_ref[...] = (
            jnp.dot(xm_ref[...], w_ih_ref[...],
                    preferred_element_type=jnp.float32) + b_ref[...])

        h = jnp.zeros((B_pad, 2 * nH), jnp.float32)   # [h_fwd | h_bwd]
        c = jnp.zeros((B_pad, 2 * nH), jnp.float32)   # [c_fwd | c_bwd]

        fwd_hs = [None] * T
        bwd_hs = [None] * T

        # Fully unrolled recurrence; fwd step t and bwd step T-1-t share ONE
        # (B_pad, 2H) @ (2H, 8H) MXU matmul per step (block-diagonal W_hh).
        for t in range(T):
            xp = xproj_ref[t * B_pad:(t + 1) * B_pad, :]   # sublane-aligned block
            gates = xp + jnp.dot(h, w_hh_ref[...],
                                 preferred_element_type=jnp.float32)
            sig = jax.nn.sigmoid(gates[:, 0:6 * nH])       # i | f | o in one EUP call
            g = jnp.tanh(gates[:, 6 * nH:8 * nH])
            i = sig[:, 0:2 * nH]
            f = sig[:, 2 * nH:4 * nH]
            o = sig[:, 4 * nH:6 * nH]
            c = f * c + i * g
            h = o * jnp.tanh(c)
            fwd_hs[t] = h[:, 0:nH]                # fwd hidden at time t
            bwd_hs[T - 1 - t] = h[:, nH:2 * nH]   # bwd hidden at time T-1-t

        # ---- assemble recurrent output in vregs (no VMEM round trip) and do one
        #      (T*B_pad, 2H) @ (2H, nOut) MXU call + a single output store.
        rec = jnp.concatenate(
            [jnp.concatenate(fwd_hs, axis=0),
             jnp.concatenate(bwd_hs, axis=0)], axis=1)
        out_ref[...] = (
            jnp.dot(rec, w_emb_ref[...],
                    preferred_element_type=jnp.float32) + b_emb_ref[...])

    return kernel


def bidirectional_lstm(x, params):
    T, B, nIn = x.shape
    nH = params["w_hh_f"].shape[0]
    nOut = params["w_emb_f"].shape[1]

    # Pad batch to the f32 sublane tile (8 rows) so every (B, .) tile in the
    # recurrence is vreg-aligned; padded rows are independent and sliced off.
    B_pad = ((B + 7) // 8) * 8

    x_pad = jnp.pad(x, ((0, 0), (0, B_pad - B), (0, 0)))
    x2d = x_pad.reshape(T * B_pad, nIn)
    xrev2d = x_pad[::-1].reshape(T * B_pad, nIn)
    x_merged = jnp.concatenate([x2d, xrev2d], axis=1)        # (T*B_pad, 2*nIn)

    zeros_ih = jnp.zeros_like(params["w_ih_f"])
    zeros_hh = jnp.zeros_like(params["w_hh_f"])
    # block-diagonal input weights: top rows feed fwd gate cols from x(t),
    # bottom rows feed bwd gate cols from x(T-1-t)
    w_ih_blk = jnp.concatenate([
        _pack_gates(params["w_ih_f"], zeros_ih, nH),
        _pack_gates(zeros_ih, params["w_ih_b"], nH),
    ], axis=0)                                                # (2*nIn, 8H)
    b_cat = _pack_gates(params["b_f"], params["b_b"], nH)     # (1, 8H)
    # block-diagonal recurrent weights: rows [0:H] fwd, rows [H:2H] bwd
    w_hh_blk = jnp.concatenate([
        _pack_gates(params["w_hh_f"], zeros_hh, nH),
        _pack_gates(zeros_hh, params["w_hh_b"], nH),
    ], axis=0)                                                # (2H, 8H)
    w_emb_cat = jnp.concatenate([params["w_emb_f"], params["w_emb_b"]], axis=0)

    out2d = pl.pallas_call(
        _make_kernel(T, B_pad, nH),
        out_shape=jax.ShapeDtypeStruct((T * B_pad, nOut), jnp.float32),
        in_specs=[pl.BlockSpec(memory_space=pltpu.MemorySpace.VMEM)
                  for _ in range(6)],
        out_specs=pl.BlockSpec(memory_space=pltpu.MemorySpace.VMEM),
        scratch_shapes=[
            pltpu.VMEM((T * B_pad, 8 * nH), jnp.float32),     # hoisted x-projection
        ],
        compiler_params=pltpu.CompilerParams(
            vmem_limit_bytes=16 * 1024 * 1024),
    )(x_merged, w_ih_blk, b_cat, w_hh_blk, w_emb_cat, params["b_emb"])

    return out2d.reshape(T, B_pad, nOut)[:, :B, :]


# ----- pure-JAX reference (same math) for verification -----
def _lstm_dir_ref(x, w_ih, w_hh, b):
    B = x.shape[1]
    nH = w_hh.shape[0]

    def step(carry, x_t):
        h, c = carry
        gates = x_t @ w_ih + h @ w_hh + b
        i = jax.nn.sigmoid(gates[:, :nH])
        f = jax.nn.sigmoid(gates[:, nH:2 * nH])
        g = jnp.tanh(gates[:, 2 * nH:3 * nH])
        o = jax.nn.sigmoid(gates[:, 3 * nH:])
        c = f * c + i * g
        h = o * jnp.tanh(c)
        return (h, c), h

    init = (jnp.zeros((B, nH), jnp.float32), jnp.zeros((B, nH), jnp.float32))
    _, hs = lax.scan(step, init, x)
    return hs


def reference(x, p):
    h_fwd = _lstm_dir_ref(x, p["w_ih_f"], p["w_hh_f"], p["b_f"])
    h_bwd = _lstm_dir_ref(x[::-1], p["w_ih_b"], p["w_hh_b"], p["b_b"])[::-1]
    rec = jnp.concatenate([h_fwd, h_bwd], axis=-1)            # (T, B, 2*nH)
    w_emb = jnp.concatenate([p["w_emb_f"], p["w_emb_b"]], axis=0)
    return rec @ w_emb + p["b_emb"]


def init_params(key, nIn, nHidden, nOut):
    k_lstm = 1.0 / np.sqrt(nHidden)
    k_lin = 1.0 / np.sqrt(2 * nHidden)
    keys = jax.random.split(key, 12)

    def u(k, shape, lim):
        return jax.random.uniform(k, shape, jnp.float32, -lim, lim)

    return {
        # forward direction (weights stored pre-transposed: (nIn, 4H), (H, 4H))
        "w_ih_f": u(keys[0], (nIn, 4 * nHidden), k_lstm),
        "w_hh_f": u(keys[1], (nHidden, 4 * nHidden), k_lstm),
        # b_ih + b_hh folded into one bias row
        "b_f": (u(keys[2], (1, 4 * nHidden), k_lstm)
                + u(keys[3], (1, 4 * nHidden), k_lstm)),
        # backward direction
        "w_ih_b": u(keys[4], (nIn, 4 * nHidden), k_lstm),
        "w_hh_b": u(keys[5], (nHidden, 4 * nHidden), k_lstm),
        "b_b": (u(keys[6], (1, 4 * nHidden), k_lstm)
                + u(keys[7], (1, 4 * nHidden), k_lstm)),
        # embedding Linear(2H -> nOut), stored as two (H, nOut) halves
        "w_emb_f": u(keys[8], (nHidden, nOut), k_lin),
        "w_emb_b": u(keys[9], (nHidden, nOut), k_lin),
        "b_emb": u(keys[10], (1, nOut), k_lin),
    }


if __name__ == "__main__":
    T, B, nIn, nHidden, nOut = 8, 2, 32, 32, 16
    key = jax.random.PRNGKey(0)
    kx, kp = jax.random.split(key)
    x = jax.random.normal(kx, (T, B, nIn), jnp.float32)
    params = init_params(kp, nIn, nHidden, nOut)

    out = bidirectional_lstm(x, params)
    out = jax.block_until_ready(out)

    ref = jax.block_until_ready(reference(x, params))
    np.testing.assert_allclose(np.asarray(out), np.asarray(ref),
                               rtol=1e-4, atol=1e-4)
    print("KERNEL_OK")
</pallas_src>

<mosaic_0001>
module attributes {stable_mosaic.version = 11 : i64} {
  func.func @kernel(%arg0: memref<64x64xf32, #tpu.memory_space<vmem>>, %arg1: memref<64x256xf32, #tpu.memory_space<vmem>>, %arg2: memref<1x256xf32, #tpu.memory_space<vmem>>, %arg3: memref<64x256xf32, #tpu.memory_space<vmem>>, %arg4: memref<64x16xf32, #tpu.memory_space<vmem>>, %arg5: memref<1x16xf32, #tpu.memory_space<vmem>>, %arg6: memref<64x16xf32, #tpu.memory_space<vmem>>, %arg7: memref<64x256xf32, #tpu.memory_space<vmem>>) attributes {dimension_semantics = [], scalar_prefetch = 0 : i64, scratch_operands = 1 : i64, tpu.core_type = #tpu.core_type<tc>} {
    %c0 = arith.constant 0 : index
    %c0_0 = arith.constant 0 : index
    %0 = vector.load %arg0[%c0, %c0_0] : memref<64x64xf32, #tpu.memory_space<vmem>>, vector<64x64xf32>
    %c0_1 = arith.constant 0 : index
    %c0_2 = arith.constant 0 : index
    %1 = vector.load %arg1[%c0_1, %c0_2] : memref<64x256xf32, #tpu.memory_space<vmem>>, vector<64x256xf32>
    %cst = arith.constant dense<0.000000e+00> : vector<64x256xf32>
    %2 = tpu.matmul %0, %1, %cst {dimension_numbers = #tpu.dot_dimension_numbers<[1], [0], [0], [1], [0, 0, 1, 1], [], []>} : vector<64x64xf32>, vector<64x256xf32>, vector<64x256xf32> -> vector<64x256xf32>
    %c0_3 = arith.constant 0 : index
    %c0_4 = arith.constant 0 : index
    %3 = vector.load %arg2[%c0_3, %c0_4] : memref<1x256xf32, #tpu.memory_space<vmem>>, vector<1x256xf32>
    %4 = vector.broadcast %3 : vector<1x256xf32> to vector<64x256xf32>
    %5 = arith.addf %2, %4 : vector<64x256xf32>
    %c0_5 = arith.constant 0 : index
    %c0_6 = arith.constant 0 : index
    %6 = vector.load %arg7[%c0_5, %c0_6] : memref<64x256xf32, #tpu.memory_space<vmem>>, vector<64x256xf32>
    tpu.vector_store %arg7[%c0_5, %c0_6], %5 {strides = array<i32>} : memref<64x256xf32, #tpu.memory_space<vmem>>, vector<64x256xf32>,
    %cst_7 = arith.constant 0.000000e+00 : f32
    %7 = vector.broadcast %cst_7 : f32 to vector<8x64xf32>
    %cst_8 = arith.constant 0.000000e+00 : f32
    %8 = vector.broadcast %cst_8 : f32 to vector<8x64xf32>
    %c0_9 = arith.constant 0 : index
    %c0_10 = arith.constant 0 : index
    %9 = vector.load %arg7[%c0_9, %c0_10] : memref<64x256xf32, #tpu.memory_space<vmem>>, vector<8x256xf32>
    %c0_11 = arith.constant 0 : index
    %c0_12 = arith.constant 0 : index
    %10 = vector.load %arg3[%c0_11, %c0_12] : memref<64x256xf32, #tpu.memory_space<vmem>>, vector<64x256xf32>
    %cst_13 = arith.constant dense<0.000000e+00> : vector<8x256xf32>
    %11 = tpu.matmul %7, %10, %cst_13 {dimension_numbers = #tpu.dot_dimension_numbers<[1], [0], [0], [1], [0, 0, 1, 1], [], []>} : vector<8x64xf32>, vector<64x256xf32>, vector<8x256xf32> -> vector<8x256xf32>
    %12 = arith.addf %9, %11 : vector<8x256xf32>
    %13 = vector.extract_strided_slice %12 {offsets = [0, 0], sizes = [8, 192], strides = [1, 1]} : vector<8x256xf32> to vector<8x192xf32>
    %14 = arith.negf %13 : vector<8x192xf32>
    %15 = math.exp %14 : vector<8x192xf32>
    %cst_14 = arith.constant 1.000000e+00 : f32
    %16 = vector.broadcast %cst_14 : f32 to vector<8x192xf32>
    %17 = arith.addf %16, %15 : vector<8x192xf32>
    %18 = arith.divf %16, %17 : vector<8x192xf32>
    %19 = vector.extract_strided_slice %12 {offsets = [0, 192], sizes = [8, 64], strides = [1, 1]} : vector<8x256xf32> to vector<8x64xf32>
    %20 = math.tanh %19 : vector<8x64xf32>
    %21 = vector.extract_strided_slice %18 {offsets = [0, 0], sizes = [8, 64], strides = [1, 1]} : vector<8x192xf32> to vector<8x64xf32>
    %22 = vector.extract_strided_slice %18 {offsets = [0, 64], sizes = [8, 64], strides = [1, 1]} : vector<8x192xf32> to vector<8x64xf32>
    %23 = vector.extract_strided_slice %18 {offsets = [0, 128], sizes = [8, 64], strides = [1, 1]} : vector<8x192xf32> to vector<8x64xf32>
    %24 = arith.mulf %22, %8 : vector<8x64xf32>
    %25 = arith.mulf %21, %20 : vector<8x64xf32>
    %26 = arith.addf %24, %25 : vector<8x64xf32>
    %27 = math.tanh %26 : vector<8x64xf32>
    %28 = arith.mulf %23, %27 : vector<8x64xf32>
    %29 = vector.extract_strided_slice %28 {offsets = [0, 0], sizes = [8, 32], strides = [1, 1]} : vector<8x64xf32> to vector<8x32xf32>
    %30 = vector.extract_strided_slice %28 {offsets = [0, 32], sizes = [8, 32], strides = [1, 1]} : vector<8x64xf32> to vector<8x32xf32>
    %c8 = arith.constant 8 : index
    %c0_15 = arith.constant 0 : index
    %31 = vector.load %arg7[%c8, %c0_15] : memref<64x256xf32, #tpu.memory_space<vmem>>, vector<8x256xf32>
    %c0_16 = arith.constant 0 : index
    %c0_17 = arith.constant 0 : index
    %32 = vector.load %arg3[%c0_16, %c0_17] : memref<64x256xf32, #tpu.memory_space<vmem>>, vector<64x256xf32>
    %cst_18 = arith.constant dense<0.000000e+00> : vector<8x256xf32>
    %33 = tpu.matmul %28, %32, %cst_18 {dimension_numbers = #tpu.dot_dimension_numbers<[1], [0], [0], [1], [0, 0, 1, 1], [], []>} : vector<8x64xf32>, vector<64x256xf32>, vector<8x256xf32> -> vector<8x256xf32>
    %34 = arith.addf %31, %33 : vector<8x256xf32>
    %35 = vector.extract_strided_slice %34 {offsets = [0, 0], sizes = [8, 192], strides = [1, 1]} : vector<8x256xf32> to vector<8x192xf32>
    %36 = arith.negf %35 : vector<8x192xf32>
    %37 = math.exp %36 : vector<8x192xf32>
    %cst_19 = arith.constant 1.000000e+00 : f32
    %38 = vector.broadcast %cst_19 : f32 to vector<8x192xf32>
    %39 = arith.addf %38, %37 : vector<8x192xf32>
    %40 = arith.divf %38, %39 : vector<8x192xf32>
    %41 = vector.extract_strided_slice %34 {offsets = [0, 192], sizes = [8, 64], strides = [1, 1]} : vector<8x256xf32> to vector<8x64xf32>
    %42 = math.tanh %41 : vector<8x64xf32>
    %43 = vector.extract_strided_slice %40 {offsets = [0, 0], sizes = [8, 64], strides = [1, 1]} : vector<8x192xf32> to vector<8x64xf32>
    %44 = vector.extract_strided_slice %40 {offsets = [0, 64], sizes = [8, 64], strides = [1, 1]} : vector<8x192xf32> to vector<8x64xf32>
    %45 = vector.extract_strided_slice %40 {offsets = [0, 128], sizes = [8, 64], strides = [1, 1]} : vector<8x192xf32> to vector<8x64xf32>
    %46 = arith.mulf %44, %26 : vector<8x64xf32>
    %47 = arith.mulf %43, %42 : vector<8x64xf32>
    %48 = arith.addf %46, %47 : vector<8x64xf32>
    %49 = math.tanh %48 : vector<8x64xf32>
    %50 = arith.mulf %45, %49 : vector<8x64xf32>
    %51 = vector.extract_strided_slice %50 {offsets = [0, 0], sizes = [8, 32], strides = [1, 1]} : vector<8x64xf32> to vector<8x32xf32>
    %52 = vector.extract_strided_slice %50 {offsets = [0, 32], sizes = [8, 32], strides = [1, 1]} : vector<8x64xf32> to vector<8x32xf32>
    %c16 = arith.constant 16 : index
    %c0_20 = arith.constant 0 : index
    %53 = vector.load %arg7[%c16, %c0_20] : memref<64x256xf32, #tpu.memory_space<vmem>>, vector<8x256xf32>
    %c0_21 = arith.constant 0 : index
    %c0_22 = arith.constant 0 : index
    %54 = vector.load %arg3[%c0_21, %c0_22] : memref<64x256xf32, #tpu.memory_space<vmem>>, vector<64x256xf32>
    %cst_23 = arith.constant dense<0.000000e+00> : vector<8x256xf32>
    %55 = tpu.matmul %50, %54, %cst_23 {dimension_numbers = #tpu.dot_dimension_numbers<[1], [0], [0], [1], [0, 0, 1, 1], [], []>} : vector<8x64xf32>, vector<64x256xf32>, vector<8x256xf32> -> vector<8x256xf32>
    %56 = arith.addf %53, %55 : vector<8x256xf32>
    %57 = vector.extract_strided_slice %56 {offsets = [0, 0], sizes = [8, 192], strides = [1, 1]} : vector<8x256xf32> to vector<8x192xf32>
    %58 = arith.negf %57 : vector<8x192xf32>
    %59 = math.exp %58 : vector<8x192xf32>
    %cst_24 = arith.constant 1.000000e+00 : f32
    %60 = vector.broadcast %cst_24 : f32 to vector<8x192xf32>
    %61 = arith.addf %60, %59 : vector<8x192xf32>
    %62 = arith.divf %60, %61 : vector<8x192xf32>
    %63 = vector.extract_strided_slice %56 {offsets = [0, 192], sizes = [8, 64], strides = [1, 1]} : vector<8x256xf32> to vector<8x64xf32>
    %64 = math.tanh %63 : vector<8x64xf32>
    %65 = vector.extract_strided_slice %62 {offsets = [0, 0], sizes = [8, 64], strides = [1, 1]} : vector<8x192xf32> to vector<8x64xf32>
    %66 = vector.extract_strided_slice %62 {offsets = [0, 64], sizes = [8, 64], strides = [1, 1]} : vector<8x192xf32> to vector<8x64xf32>
    %67 = vector.extract_strided_slice %62 {offsets = [0, 128], sizes = [8, 64], strides = [1, 1]} : vector<8x192xf32> to vector<8x64xf32>
    %68 = arith.mulf %66, %48 : vector<8x64xf32>
    %69 = arith.mulf %65, %64 : vector<8x64xf32>
    %70 = arith.addf %68, %69 : vector<8x64xf32>
    %71 = math.tanh %70 : vector<8x64xf32>
    %72 = arith.mulf %67, %71 : vector<8x64xf32>
    %73 = vector.extract_strided_slice %72 {offsets = [0, 0], sizes = [8, 32], strides = [1, 1]} : vector<8x64xf32> to vector<8x32xf32>
    %74 = vector.extract_strided_slice %72 {offsets = [0, 32], sizes = [8, 32], strides = [1, 1]} : vector<8x64xf32> to vector<8x32xf32>
    %c24 = arith.constant 24 : index
    %c0_25 = arith.constant 0 : index
    %75 = vector.load %arg7[%c24, %c0_25] : memref<64x256xf32, #tpu.memory_space<vmem>>, vector<8x256xf32>
    %c0_26 = arith.constant 0 : index
    %c0_27 = arith.constant 0 : index
    %76 = vector.load %arg3[%c0_26, %c0_27] : memref<64x256xf32, #tpu.memory_space<vmem>>, vector<64x256xf32>
    %cst_28 = arith.constant dense<0.000000e+00> : vector<8x256xf32>
    %77 = tpu.matmul %72, %76, %cst_28 {dimension_numbers = #tpu.dot_dimension_numbers<[1], [0], [0], [1], [0, 0, 1, 1], [], []>} : vector<8x64xf32>, vector<64x256xf32>, vector<8x256xf32> -> vector<8x256xf32>
    %78 = arith.addf %75, %77 : vector<8x256xf32>
    %79 = vector.extract_strided_slice %78 {offsets = [0, 0], sizes = [8, 192], strides = [1, 1]} : vector<8x256xf32> to vector<8x192xf32>
    %80 = arith.negf %79 : vector<8x192xf32>
    %81 = math.exp %80 : vector<8x192xf32>
    %cst_29 = arith.constant 1.000000e+00 : f32
    %82 = vector.broadcast %cst_29 : f32 to vector<8x192xf32>
    %83 = arith.addf %82, %81 : vector<8x192xf32>
    %84 = arith.divf %82, %83 : vector<8x192xf32>
    %85 = vector.extract_strided_slice %78 {offsets = [0, 192], sizes = [8, 64], strides = [1, 1]} : vector<8x256xf32> to vector<8x64xf32>
    %86 = math.tanh %85 : vector<8x64xf32>
    %87 = vector.extract_strided_slice %84 {offsets = [0, 0], sizes = [8, 64], strides = [1, 1]} : vector<8x192xf32> to vector<8x64xf32>
    %88 = vector.extract_strided_slice %84 {offsets = [0, 64], sizes = [8, 64], strides = [1, 1]} : vector<8x192xf32> to vector<8x64xf32>
    %89 = vector.extract_strided_slice %84 {offsets = [0, 128], sizes = [8, 64], strides = [1, 1]} : vector<8x192xf32> to vector<8x64xf32>
    %90 = arith.mulf %88, %70 : vector<8x64xf32>
    %91 = arith.mulf %87, %86 : vector<8x64xf32>
    %92 = arith.addf %90, %91 : vector<8x64xf32>
    %93 = math.tanh %92 : vector<8x64xf32>
    %94 = arith.mulf %89, %93 : vector<8x64xf32>
    %95 = vector.extract_strided_slice %94 {offsets = [0, 0], sizes = [8, 32], strides = [1, 1]} : vector<8x64xf32> to vector<8x32xf32>
    %96 = vector.extract_strided_slice %94 {offsets = [0, 32], sizes = [8, 32], strides = [1, 1]} : vector<8x64xf32> to vector<8x32xf32>
    %c32 = arith.constant 32 : index
    %c0_30 = arith.constant 0 : index
    %97 = vector.load %arg7[%c32, %c0_30] : memref<64x256xf32, #tpu.memory_space<vmem>>, vector<8x256xf32>
    %c0_31 = arith.constant 0 : index
    %c0_32 = arith.constant 0 : index
    %98 = vector.load %arg3[%c0_31, %c0_32] : memref<64x256xf32, #tpu.memory_space<vmem>>, vector<64x256xf32>
    %cst_33 = arith.constant dense<0.000000e+00> : vector<8x256xf32>
    %99 = tpu.matmul %94, %98, %cst_33 {dimension_numbers = #tpu.dot_dimension_numbers<[1], [0], [0], [1], [0, 0, 1, 1], [], []>} : vector<8x64xf32>, vector<64x256xf32>, vector<8x256xf32> -> vector<8x256xf32>
    %100 = arith.addf %97, %99 : vector<8x256xf32>
    %101 = vector.extract_strided_slice %100 {offsets = [0, 0], sizes = [8, 192], strides = [1, 1]} : vector<8x256xf32> to vector<8x192xf32>
    %102 = arith.negf %101 : vector<8x192xf32>
    %103 = math.exp %102 : vector<8x192xf32>
    %cst_34 = arith.constant 1.000000e+00 : f32
    %104 = vector.broadcast %cst_34 : f32 to vector<8x192xf32>
    %105 = arith.addf %104, %103 : vector<8x192xf32>
    %106 = arith.divf %104, %105 : vector<8x192xf32>
    %107 = vector.extract_strided_slice %100 {offsets = [0, 192], sizes = [8, 64], strides = [1, 1]} : vector<8x256xf32> to vector<8x64xf32>
    %108 = math.tanh %107 : vector<8x64xf32>
    %109 = vector.extract_strided_slice %106 {offsets = [0, 0], sizes = [8, 64], strides = [1, 1]} : vector<8x192xf32> to vector<8x64xf32>
    %110 = vector.extract_strided_slice %106 {offsets = [0, 64], sizes = [8, 64], strides = [1, 1]} : vector<8x192xf32> to vector<8x64xf32>
    %111 = vector.extract_strided_slice %106 {offsets = [0, 128], sizes = [8, 64], strides = [1, 1]} : vector<8x192xf32> to vector<8x64xf32>
    %112 = arith.mulf %110, %92 : vector<8x64xf32>
    %113 = arith.mulf %109, %108 : vector<8x64xf32>
    %114 = arith.addf %112, %113 : vector<8x64xf32>
    %115 = math.tanh %114 : vector<8x64xf32>
    %116 = arith.mulf %111, %115 : vector<8x64xf32>
    %117 = vector.extract_strided_slice %116 {offsets = [0, 0], sizes = [8, 32], strides = [1, 1]} : vector<8x64xf32> to vector<8x32xf32>
    %118 = vector.extract_strided_slice %116 {offsets = [0, 32], sizes = [8, 32], strides = [1, 1]} : vector<8x64xf32> to vector<8x32xf32>
    %c40 = arith.constant 40 : index
    %c0_35 = arith.constant 0 : index
    %119 = vector.load %arg7[%c40, %c0_35] : memref<64x256xf32, #tpu.memory_space<vmem>>, vector<8x256xf32>
    %c0_36 = arith.constant 0 : index
    %c0_37 = arith.constant 0 : index
    %120 = vector.load %arg3[%c0_36, %c0_37] : memref<64x256xf32, #tpu.memory_space<vmem>>, vector<64x256xf32>
    %cst_38 = arith.constant dense<0.000000e+00> : vector<8x256xf32>
    %121 = tpu.matmul %116, %120, %cst_38 {dimension_numbers = #tpu.dot_dimension_numbers<[1], [0], [0], [1], [0, 0, 1, 1], [], []>} : vector<8x64xf32>, vector<64x256xf32>, vector<8x256xf32> -> vector<8x256xf32>
    %122 = arith.addf %119, %121 : vector<8x256xf32>
    %123 = vector.extract_strided_slice %122 {offsets = [0, 0], sizes = [8, 192], strides = [1, 1]} : vector<8x256xf32> to vector<8x192xf32>
    %124 = arith.negf %123 : vector<8x192xf32>
    %125 = math.exp %124 : vector<8x192xf32>
    %cst_39 = arith.constant 1.000000e+00 : f32
    %126 = vector.broadcast %cst_39 : f32 to vector<8x192xf32>
    %127 = arith.addf %126, %125 : vector<8x192xf32>
    %128 = arith.divf %126, %127 : vector<8x192xf32>
    %129 = vector.extract_strided_slice %122 {offsets = [0, 192], sizes = [8, 64], strides = [1, 1]} : vector<8x256xf32> to vector<8x64xf32>
    %130 = math.tanh %129 : vector<8x64xf32>
    %131 = vector.extract_strided_slice %128 {offsets = [0, 0], sizes = [8, 64], strides = [1, 1]} : vector<8x192xf32> to vector<8x64xf32>
    %132 = vector.extract_strided_slice %128 {offsets = [0, 64], sizes = [8, 64], strides = [1, 1]} : vector<8x192xf32> to vector<8x64xf32>
    %133 = vector.extract_strided_slice %128 {offsets = [0, 128], sizes = [8, 64], strides = [1, 1]} : vector<8x192xf32> to vector<8x64xf32>
    %134 = arith.mulf %132, %114 : vector<8x64xf32>
    %135 = arith.mulf %131, %130 : vector<8x64xf32>
    %136 = arith.addf %134, %135 : vector<8x64xf32>
    %137 = math.tanh %136 : vector<8x64xf32>
    %138 = arith.mulf %133, %137 : vector<8x64xf32>
    %139 = vector.extract_strided_slice %138 {offsets = [0, 0], sizes = [8, 32], strides = [1, 1]} : vector<8x64xf32> to vector<8x32xf32>
    %140 = vector.extract_strided_slice %138 {offsets = [0, 32], sizes = [8, 32], strides = [1, 1]} : vector<8x64xf32> to vector<8x32xf32>
    %c48 = arith.constant 48 : index
    %c0_40 = arith.constant 0 : index
    %141 = vector.load %arg7[%c48, %c0_40] : memref<64x256xf32, #tpu.memory_space<vmem>>, vector<8x256xf32>
    %c0_41 = arith.constant 0 : index
    %c0_42 = arith.constant 0 : index
    %142 = vector.load %arg3[%c0_41, %c0_42] : memref<64x256xf32, #tpu.memory_space<vmem>>, vector<64x256xf32>
    %cst_43 = arith.constant dense<0.000000e+00> : vector<8x256xf32>
    %143 = tpu.matmul %138, %142, %cst_43 {dimension_numbers = #tpu.dot_dimension_numbers<[1], [0], [0], [1], [0, 0, 1, 1], [], []>} : vector<8x64xf32>, vector<64x256xf32>, vector<8x256xf32> -> vector<8x256xf32>
    %144 = arith.addf %141, %143 : vector<8x256xf32>
    %145 = vector.extract_strided_slice %144 {offsets = [0, 0], sizes = [8, 192], strides = [1, 1]} : vector<8x256xf32> to vector<8x192xf32>
    %146 = arith.negf %145 : vector<8x192xf32>
    %147 = math.exp %146 : vector<8x192xf32>
    %cst_44 = arith.constant 1.000000e+00 : f32
    %148 = vector.broadcast %cst_44 : f32 to vector<8x192xf32>
    %149 = arith.addf %148, %147 : vector<8x192xf32>
    %150 = arith.divf %148, %149 : vector<8x192xf32>
    %151 = vector.extract_strided_slice %144 {offsets = [0, 192], sizes = [8, 64], strides = [1, 1]} : vector<8x256xf32> to vector<8x64xf32>
    %152 = math.tanh %151 : vector<8x64xf32>
    %153 = vector.extract_strided_slice %150 {offsets = [0, 0], sizes = [8, 64], strides = [1, 1]} : vector<8x192xf32> to vector<8x64xf32>
    %154 = vector.extract_strided_slice %150 {offsets = [0, 64], sizes = [8, 64], strides = [1, 1]} : vector<8x192xf32> to vector<8x64xf32>
    %155 = vector.extract_strided_slice %150 {offsets = [0, 128], sizes = [8, 64], strides = [1, 1]} : vector<8x192xf32> to vector<8x64xf32>
    %156 = arith.mulf %154, %136 : vector<8x64xf32>
    %157 = arith.mulf %153, %152 : vector<8x64xf32>
    %158 = arith.addf %156, %157 : vector<8x64xf32>
    %159 = math.tanh %158 : vector<8x64xf32>
    %160 = arith.mulf %155, %159 : vector<8x64xf32>
    %161 = vector.extract_strided_slice %160 {offsets = [0, 0], sizes = [8, 32], strides = [1, 1]} : vector<8x64xf32> to vector<8x32xf32>
    %162 = vector.extract_strided_slice %160 {offsets = [0, 32], sizes = [8, 32], strides = [1, 1]} : vector<8x64xf32> to vector<8x32xf32>
    %c56 = arith.constant 56 : index
    %c0_45 = arith.constant 0 : index
    %163 = vector.load %arg7[%c56, %c0_45] : memref<64x256xf32, #tpu.memory_space<vmem>>, vector<8x256xf32>
    %c0_46 = arith.constant 0 : index
    %c0_47 = arith.constant 0 : index
    %164 = vector.load %arg3[%c0_46, %c0_47] : memref<64x256xf32, #tpu.memory_space<vmem>>, vector<64x256xf32>
    %cst_48 = arith.constant dense<0.000000e+00> : vector<8x256xf32>
    %165 = tpu.matmul %160, %164, %cst_48 {dimension_numbers = #tpu.dot_dimension_numbers<[1], [0], [0], [1], [0, 0, 1, 1], [], []>} : vector<8x64xf32>, vector<64x256xf32>, vector<8x256xf32> -> vector<8x256xf32>
    %166 = arith.addf %163, %165 : vector<8x256xf32>
    %167 = vector.extract_strided_slice %166 {offsets = [0, 0], sizes = [8, 192], strides = [1, 1]} : vector<8x256xf32> to vector<8x192xf32>
    %168 = arith.negf %167 : vector<8x192xf32>
    %169 = math.exp %168 : vector<8x192xf32>
    %cst_49 = arith.constant 1.000000e+00 : f32
    %170 = vector.broadcast %cst_49 : f32 to vector<8x192xf32>
    %171 = arith.addf %170, %169 : vector<8x192xf32>
    %172 = arith.divf %170, %171 : vector<8x192xf32>
    %173 = vector.extract_strided_slice %166 {offsets = [0, 192], sizes = [8, 64], strides = [1, 1]} : vector<8x256xf32> to vector<8x64xf32>
    %174 = math.tanh %173 : vector<8x64xf32>
    %175 = vector.extract_strided_slice %172 {offsets = [0, 0], sizes = [8, 64], strides = [1, 1]} : vector<8x192xf32> to vector<8x64xf32>
    %176 = vector.extract_strided_slice %172 {offsets = [0, 64], sizes = [8, 64], strides = [1, 1]} : vector<8x192xf32> to vector<8x64xf32>
    %177 = vector.extract_strided_slice %172 {offsets = [0, 128], sizes = [8, 64], strides = [1, 1]} : vector<8x192xf32> to vector<8x64xf32>
    %178 = arith.mulf %176, %158 : vector<8x64xf32>
    %179 = arith.mulf %175, %174 : vector<8x64xf32>
    %180 = arith.addf %178, %179 : vector<8x64xf32>
    %181 = math.tanh %180 : vector<8x64xf32>
    %182 = arith.mulf %177, %181 : vector<8x64xf32>
    %183 = vector.extract_strided_slice %182 {offsets = [0, 0], sizes = [8, 32], strides = [1, 1]} : vector<8x64xf32> to vector<8x32xf32>
    %184 = vector.extract_strided_slice %182 {offsets = [0, 32], sizes = [8, 32], strides = [1, 1]} : vector<8x64xf32> to vector<8x32xf32>
    %185 = tpu.concatenate %29, %51, %73, %95, %117, %139, %161, %183 in 0 : vector<8x32xf32>, vector<8x32xf32>, vector<8x32xf32>, vector<8x32xf32>, vector<8x32xf32>, vector<8x32xf32>, vector<8x32xf32>, vector<8x32xf32> -> vector<64x32xf32>
    %186 = tpu.concatenate %184, %162, %140, %118, %96, %74, %52, %30 in 0 : vector<8x32xf32>, vector<8x32xf32>, vector<8x32xf32>, vector<8x32xf32>, vector<8x32xf32>, vector<8x32xf32>, vector<8x32xf32>, vector<8x32xf32> -> vector<64x32xf32>
    %187 = tpu.concatenate %185, %186 in 1 : vector<64x32xf32>, vector<64x32xf32> -> vector<64x64xf32>
    %c0_50 = arith.constant 0 : index
    %c0_51 = arith.constant 0 : index
    %188 = vector.load %arg4[%c0_50, %c0_51] : memref<64x16xf32, #tpu.memory_space<vmem>>, vector<64x16xf32>
    %cst_52 = arith.constant dense<0.000000e+00> : vector<64x16xf32>
    %189 = tpu.matmul %187, %188, %cst_52 {dimension_numbers = #tpu.dot_dimension_numbers<[1], [0], [0], [1], [0, 0, 1, 1], [], []>} : vector<64x64xf32>, vector<64x16xf32>, vector<64x16xf32> -> vector<64x16xf32>
    %c0_53 = arith.constant 0 : index
    %c0_54 = arith.constant 0 : index
    %190 = vector.load %arg5[%c0_53, %c0_54] : memref<1x16xf32, #tpu.memory_space<vmem>>, vector<1x16xf32>
    %191 = vector.broadcast %190 : vector<1x16xf32> to vector<64x16xf32>
    %192 = arith.addf %189, %191 : vector<64x16xf32>
    %c0_55 = arith.constant 0 : index
    %c0_56 = arith.constant 0 : index
    %193 = vector.load %arg6[%c0_55, %c0_56] : memref<64x16xf32, #tpu.memory_space<vmem>>, vector<64x16xf32>
    tpu.vector_store %arg6[%c0_55, %c0_56], %192 {strides = array<i32>} : memref<64x16xf32, #tpu.memory_space<vmem>>, vector<64x16xf32>,
    return
  }
}

</mosaic_0001>

<bundles_post_ra>
// kernel: tpu_custom_call.1
= control target key start
LH: loop header
LB: loop body
LE: loop exit
PB: predicated region body
PF: predicated region fallthrough
CT: control target
= control target key end

     0   :  { %11 = vsyncpa [#allocation4], 0  ;;  %s1852_s0 = inlined_call_operand.vmem [shape: f32[64,64], index: 0, kind: input, shape index: {}]   ;;  %s1853_s1 = inlined_call_operand.hbm [shape: f32[64,256], index: 1, kind: input, shape index: {}]   ;;  %s1854_s2 = inlined_call_operand.vmem [shape: f32[1,256], index: 2, kind: input, shape index: {}]   ;;  %s1855_s3 = inlined_call_operand.hbm [shape: f32[64,256], index: 3, kind: input, shape index: {}]   ;;  %s1856_s4 = inlined_call_operand.vmem [shape: f32[64,16], index: 4, kind: input, shape index: {}]   ;;  %s1857_s5 = inlined_call_operand.vmem [shape: f32[1,16], index: 5, kind: input, shape index: {}]   ;;  %s1858_s6 = inlined_call_operand.vmem [shape: f32[64,16], index: 6, kind: output, shape index: {}]  }
   0x1   :  { %s19_s23 = sshll.u32 %s1853_s1, 4  ;;  %s20_s23 = int_to_ptr.hbm [resolvable:$true] %s19_s23 }
   0x2   :  { %12 = vsyncpa [#allocation6], 0  ;;  %s1374_s24 = smov [#allocation3]   ;;  %s34_s28 = sshll.u32 %s1855_s3, 4  ;;  %s35_s28 = int_to_ptr.hbm [resolvable:$true] %s34_s28 }
   0x3   :  { %s21_s25 = sshll.u32 %s1374_s24, 4  ;;  %s1375_s29 = smov 256   ;;  %s22_s25 = int_to_ptr.vmem [resolvable:$true] %s21_s25 }
   0x4   :  { %s1376_s30 = smov 16   ;;  %s1377_s7 = smov [#allocation5]  }
   0x5   :  { %27 = dma.hbm_to_vmem [thread:$0]  %s20_s23, 2048, %s22_s25, [#allocation4], %s1375_s29, %s1375_s29, %s1376_s30  }
   0x6   :  { %s36_s8 = sshll.u32 %s1377_s7, 4  ;;  %s37_s8 = int_to_ptr.vmem [resolvable:$true] %s36_s8 }
   0x7   :  { %42 = dma.hbm_to_vmem [thread:$0]  %s35_s28, 2048, %s37_s8, [#allocation6], %s1375_s29, %s1375_s29, %s1376_s30  }
   0x8   :  { %1370 = dma.done.wait [#allocation4], 2048  }
   0x9   :  { %1371 = vsyncadd [#allocation4], 4294965248 }
   0xa   :  { %1372 = dma.done.wait [#allocation6], 2048  }
   0xb   :  { %1373 = vsyncadd [#allocation6], 4294965248  ;;  %v77_v0 = vld [vmem:[#allocation3 + $0x70] sm:$0xff]  ;;  %v75_v1 = vld [vmem:[#allocation3 + $0x60] sm:$0xff]  ;;  %vm85_vm0 = vcmask 523264   ;;  %v1378_v40 = vmov 0.0  }
   0xc   :  { %118 = vmatpush.msra.mxu1 %v77_v0  ;;  %1203 = vmatpush.msra.mxu2 %v77_v0  ;;  %v73_v2 = vld [vmem:[#allocation3 + $0x50] sm:$0xff]  ;;  %v71_v3 = vld [vmem:[#allocation3 + $0x40] sm:$0xff]  ;;  %v1438_v12 = vld [vmem:[%s1852_s0 + $0x18] sm:$0xff] }
   0xd   :  { %1204 = vmatpush.msra.mxu3 %v77_v0  ;;  %v69_v4 = vld [vmem:[#allocation3 + $0x30] sm:$0xff]  ;;  %v67_v6 = vld [vmem:[#allocation3 + $0x20] sm:$0xff]  ;;  %v78_v14 = vld [vmem:[#allocation3 + $0x78] sm:$0xff] }
   0xe   :  { %119 = vmatpush.msra.mxu1 %v75_v1  ;;  %1205 = vmatpush.msra.mxu2 %v75_v1  ;;  %v1421_v5 = vld [vmem:[#allocation5 + $0x70] sm:$0xff]  ;;  %v1424_v7 = vld [vmem:[#allocation5 + $0x60] sm:$0xff]  ;;  %v76_v16 = vld [vmem:[#allocation3 + $0x68] sm:$0xff] }
   0xf   :  { %1206 = vmatpush.msra.mxu3 %v75_v1  ;;  %649 = vmatpush.msra.mxu0 %v1421_v5  ;;  %v65_v8 = vld [vmem:[#allocation3 + $0x10] sm:$0xff]  ;;  %v63_v10 = vld [vmem:[#allocation3] sm:$0xff]  ;;  %v1452_v17 = vld [vmem:[#allocation5 + $0x78] sm:$0xff] }
  0x10   :  { %120 = vmatpush.msra.mxu1 %v73_v2  ;;  %1207 = vmatpush.msra.mxu2 %v73_v2  ;;  %v1427_v9 = vld [vmem:[#allocation5 + $0x50] sm:$0xff]  ;;  %v1432_v11 = vld [vmem:[%s1852_s0] sm:$0xff]  ;;  %v74_v18 = vld [vmem:[#allocation3 + $0x58] sm:$0xff] }
  0x11   :  { %1208 = vmatpush.msra.mxu3 %v73_v2  ;;  %650 = vmatpush.msra.mxu0 %v1424_v7  ;;  %v1440_v13 = vld [vmem:[#allocation5 + $0x40] sm:$0xff]  ;;  %v1446_v15 = vld [vmem:[%s1852_s0 + $0x30] sm:$0xff]  ;;  %v1456_v19 = vld [vmem:[#allocation5 + $0x68] sm:$0xff] }
  0x12   :  { %121 = vmatpush.msra.mxu1 %v71_v3  ;;  %1209 = vmatpush.msra.mxu2 %v71_v3  ;;  %v1460_v20 = vld [vmem:[#allocation5 + $0x30] sm:$0xff]  ;;  %v1462_v21 = vld [vmem:[#allocation5 + $0x58] sm:$0xff]  ;;  %v72_v22 = vld [vmem:[#allocation3 + $0x48] sm:$0xff] }
  0x13   :  { %1210 = vmatpush.msra.mxu3 %v71_v3  ;;  %651 = vmatpush.msra.mxu0 %v1427_v9  ;;  %v1470_v23 = vld [vmem:[%s1852_s0 + $0x8] sm:$0xff]  ;;  %v1475_v24 = vld [vmem:[%s1852_s0 + $0x20] sm:$0xff]  ;;  %v70_v27 = vld [vmem:[#allocation3 + $0x38] sm:$0xff] }
  0x14   :  { %122 = vmatpush.msra.mxu1 %v69_v4  ;;  %1211 = vmatpush.msra.mxu2 %v69_v4  ;;  %v1477_v25 = vld [vmem:[#allocation5 + $0x20] sm:$0xff]  ;;  %v1479_v26 = vld [vmem:[#allocation5 + $0x48] sm:$0xff]  ;;  %v1487_v28 = vld [vmem:[%s1852_s0 + $0x38] sm:$0xff] }
  0x15   :  { %1212 = vmatpush.msra.mxu3 %v69_v4  ;;  %652 = vmatpush.msra.mxu0 %v1440_v13  ;;  %v1493_v29 = vld [vmem:[#allocation5 + $0x38] sm:$0xff]  ;;  %v68_v30 = vld [vmem:[#allocation3 + $0x28] sm:$0xff]  ;;  %v1502_v33 = vld [vmem:[#allocation5 + $0x10] sm:$0xff] }
  0x16   :  { %123 = vmatpush.msra.mxu1 %v67_v6  ;;  %1213 = vmatpush.msra.mxu2 %v67_v6  ;;  %v1498_v31 = vld [vmem:[#allocation5 + $0x28] sm:$0xff]  ;;  %v66_v32 = vld [vmem:[#allocation3 + $0x18] sm:$0xff]  ;;  %v57_v36 = vld [vmem:[%s1852_s0 + $0x10] sm:$0xff] }
  0x17   :  { %1214 = vmatpush.msra.mxu3 %v67_v6  ;;  %653 = vmatpush.msra.mxu0 %v1460_v20  ;;  %v1504_v34 = vld [vmem:[#allocation5 + $0x18] sm:$0xff]  ;;  %v64_v35 = vld [vmem:[#allocation3 + $0x8] sm:$0xff]  ;;  %v1517_v38 = vld [vmem:[#allocation5] sm:$0xff] }
  0x18   :  { %124 = vmatpush.msra.mxu1 %v65_v8  ;;  %1215 = vmatpush.msra.mxu2 %v65_v8  ;;  %v1515_v37 = vld [vmem:[%s1852_s0 + $0x28] sm:$0xff]  ;;  %v79_v42 = vld [vmem:[%s1854_s2] sm:$0x3]  ;;  %s1379_s2 = smov 64  }
  0x19   :  { %1216 = vmatpush.msra.mxu3 %v65_v8  ;;  %654 = vmatpush.msra.mxu0 %v1477_v25  ;;  %v1519_v39 = vld [vmem:[#allocation5 + $0x8] sm:$0xff]  ;;  %v81_v43 = vperm.slane %v79_v42, 0  ;;  %v1616_v56 = vperm.slane %v79_v42, 1 }
  0x1a   :  { %125 = vmatpush.msra.mxu1 %v63_v10  ;;  %1217 = vmatpush.msra.mxu2 %v63_v10 }
  0x1b   :  { %1149 = vmatmul.msk.f32.vlgmr.msra.gmra.mxu1 %vm85_vm0, %v1432_v11  ;;  %1152 = vmatmul.msk.f32.vlgmr.msra.gmra.mxu2 %vm85_vm0, %v1438_v12 }
  0x1c   :  { %159 = vmatpush.msrb.mxu1 %v78_v14  ;;  %1218 = vmatpush.msra.mxu3 %v63_v10 }
  0x1d   :  { %1155 = vmatmul.msk.f32.vlgmr.msra.gmra.mxu3 %vm85_vm0, %v1446_v15  ;;  %237 = vmatpush.msrb.mxu2 %v1421_v5 }
  0x1e   :  { %160 = vmatpush.msrb.mxu1 %v76_v16  ;;  %257 = vmatpush.msrb.mxu3 %v1452_v17 }
  0x1f   :  { %238 = vmatpush.msrb.mxu2 %v1424_v7  ;;  %655 = vmatpush.msra.mxu0 %v1502_v33 }
  0x20   :  { %161 = vmatpush.msrb.mxu1 %v74_v18  ;;  %258 = vmatpush.msrb.mxu3 %v1456_v19 }
  0x21   :  { %239 = vmatpush.msrb.mxu2 %v1427_v9  ;;  %656 = vmatpush.msra.mxu0 %v1517_v38 }
  0x22   :  { %259 = vmatpush.msrb.mxu3 %v1462_v21  ;;  %162 = vmatpush.msrb.mxu1 %v72_v22 }
  0x23   :  { %1150 = vmatmul.msk.f32.gmra.mxu1 %vm85_vm0, %v1470_v23  ;;  %1153 = vmatmul.msk.f32.gmra.mxu2 %vm85_vm0, %v1475_v24 }
  0x24   :  { %260 = vmatpush.msrb.mxu3 %v1479_v26  ;;  %163 = vmatpush.msrb.mxu1 %v70_v27 }
  0x25   :  { %1156 = vmatmul.msk.f32.gmra.mxu3 %vm85_vm0, %v1487_v28  ;;  %240 = vmatpush.msrb.mxu2 %v1440_v13 }
  0x26   :  { %261 = vmatpush.msrb.mxu3 %v1493_v29  ;;  %164 = vmatpush.msrb.mxu1 %v68_v30 }
  0x27   :  { %241 = vmatpush.msrb.mxu2 %v1460_v20  ;;  %855 = vmatpush.msrb.mxu0 %v1421_v5 }
  0x28   :  { %262 = vmatpush.msrb.mxu3 %v1498_v31  ;;  %165 = vmatpush.msrb.mxu1 %v66_v32 }
  0x29   :  { %242 = vmatpush.msrb.mxu2 %v1477_v25  ;;  %856 = vmatpush.msrb.mxu0 %v1424_v7 }
  0x2a   :  { %263 = vmatpush.msrb.mxu3 %v1504_v34  ;;  %166 = vmatpush.msrb.mxu1 %v64_v35 }
  0x2b   :  { %1151 = vmatmul.msk.f32.gmra.mxu1 %vm85_vm0, %v57_v36  ;;  %1154 = vmatmul.msk.f32.gmra.mxu2 %vm85_vm0, %v1515_v37 }
  0x2c   :  { %264 = vmatpush.msrb.mxu3 %v1519_v39  ;;  %243 = vmatpush.msrb.mxu2 %v1502_v33 }
  0x2d   :  { %265 = vmatmul.f32.vlgmr.msrb.gmra.mxu3 %v1378_v40  ;;  %669 = vmatpush.msra.mxu1 %v1452_v17 }
  0x2e   :  { %244 = vmatpush.msrb.mxu2 %v1517_v38  ;;  %360 = vmatpush.msra.mxu3 %v1452_v17 }
  0x2f   :  { %670 = vmatpush.msra.mxu1 %v1456_v19  ;;  %857 = vmatpush.msrb.mxu0 %v1427_v9 }
  0x30   :  { %340 = vmatpush.msra.mxu2 %v1421_v5  ;;  %361 = vmatpush.msra.mxu3 %v1456_v19 }
  0x31   :  { %671 = vmatpush.msra.mxu1 %v1462_v21  ;;  %858 = vmatpush.msrb.mxu0 %v1440_v13 }
  0x32   :  { %341 = vmatpush.msra.mxu2 %v1424_v7  ;;  %362 = vmatpush.msra.mxu3 %v1462_v21 }
  0x33   :  { %1157 = vmatmul.msk.f32.vlgmr.msrb.gmra.mxu1 %vm85_vm0, %v1432_v11  ;;  %245 = vmatmul.f32.vlgmr.msrb.gmra.mxu2 %v1378_v40 }
  0x34   :  { %342 = vmatpush.msra.mxu2 %v1427_v9  ;;  %363 = vmatpush.msra.mxu3 %v1479_v26 }
  0x35   :  { %672 = vmatpush.msra.mxu1 %v1479_v26  ;;  %859 = vmatpush.msrb.mxu0 %v1460_v20 }
  0x36   :  { %343 = vmatpush.msra.mxu2 %v1440_v13  ;;  %364 = vmatpush.msra.mxu3 %v1493_v29 }
  0x37   :  { %673 = vmatpush.msra.mxu1 %v1493_v29  ;;  %860 = vmatpush.msrb.mxu0 %v1477_v25 }
  0x38   :  { %344 = vmatpush.msra.mxu2 %v1460_v20  ;;  %365 = vmatpush.msra.mxu3 %v1498_v31 }
  0x39   :  { %674 = vmatpush.msra.mxu1 %v1498_v31  ;;  %861 = vmatpush.msrb.mxu0 %v1502_v33 }
  0x3a   :  { %345 = vmatpush.msra.mxu2 %v1477_v25  ;;  %366 = vmatpush.msra.mxu3 %v1504_v34 }
  0x3b   :  { %1158 = vmatmul.msk.f32.gmra.mxu1 %vm85_vm0, %v1470_v23  ;;  %862 = vmatpush.msrb.mxu0 %v1517_v38 }
  0x3c   :  { %346 = vmatpush.msra.mxu2 %v1502_v33  ;;  %367 = vmatpush.msra.mxu3 %v1519_v39 }
  0x3d   :  { %675 = vmatpush.msra.mxu1 %v1504_v34 }
  0x3e   :  { %463 = vmatpush.msrb.mxu3 %v1452_v17  ;;  %347 = vmatpush.msra.mxu2 %v1517_v38 }
  0x3f   :  { %676 = vmatpush.msra.mxu1 %v1519_v39 }
  0x40   :  { %443 = vmatpush.msrb.mxu2 %v1421_v5  ;;  %464 = vmatpush.msrb.mxu3 %v1456_v19 }
  0x41   :  { %875 = vmatpush.msrb.mxu1 %v1452_v17 }
  0x42   :  { %444 = vmatpush.msrb.mxu2 %v1424_v7  ;;  %465 = vmatpush.msrb.mxu3 %v1462_v21 }
  0x43   :  { %1159 = vmatmul.msk.f32.gmra.mxu1 %vm85_vm0, %v57_v36 }
  0x44   :  { %445 = vmatpush.msrb.mxu2 %v1427_v9  ;;  %466 = vmatpush.msrb.mxu3 %v1479_v26 }
  0x45   :  { %876 = vmatpush.msrb.mxu1 %v1456_v19 }
  0x46   :  { %446 = vmatpush.msrb.mxu2 %v1440_v13  ;;  %467 = vmatpush.msrb.mxu3 %v1493_v29 }
  0x47   :  { %877 = vmatpush.msrb.mxu1 %v1462_v21 }
  0x48   :  { %447 = vmatpush.msrb.mxu2 %v1460_v20  ;;  %468 = vmatpush.msrb.mxu3 %v1498_v31 }
  0x49   :  { %878 = vmatpush.msrb.mxu1 %v1479_v26 }
  0x4a   :  { %448 = vmatpush.msrb.mxu2 %v1477_v25  ;;  %469 = vmatpush.msrb.mxu3 %v1504_v34 }
  0x4b   :  { %1160 = vmatmul.msk.f32.gmra.mxu1 %vm85_vm0, %v1438_v12 }
  0x4c   :  { %449 = vmatpush.msrb.mxu2 %v1502_v33  ;;  %470 = vmatpush.msrb.mxu3 %v1519_v39 }
  0x4d   :  { %879 = vmatpush.msrb.mxu1 %v1493_v29 }
  0x4e   :  { %450 = vmatpush.msrb.mxu2 %v1517_v38 }
  0x4f   :  { %880 = vmatpush.msrb.mxu1 %v1498_v31 }
  0x51   :  { %881 = vmatpush.msrb.mxu1 %v1504_v34 }
  0x53   :  { %882 = vmatpush.msrb.mxu1 %v1519_v39 }
  0x54   :  { %1161 = vmatmul.msk.f32.gmra.mxu1 %vm85_vm0, %v1475_v24 }
  0x5c   :  { %1162 = vmatmul.msk.f32.gmra.mxu1 %vm85_vm0, %v1515_v37 }
  0x64   :  { %1163 = vmatmul.msk.f32.gmra.mxu1 %vm85_vm0, %v1446_v15 }
  0x6c   :  { %1164 = vmatmul.msk.f32.gmra.mxu1 %vm85_vm0, %v1487_v28 }
  0x98   :  { %v127_v41 = vpop.f32.mrf.mxu1 }
  0x99   :  { %v128_v1 = vadd.f32 %v127_v41, %v81_v43 }
  0x9e   :  { %v136_v44 = vpop.f32.mrf.mxu2 }
  0x9f   :  { %v1604_v45 = vadd.f32 %v136_v44, %v81_v43 }
  0xa0   :  { %v130_v46 = vpop.f32.mrf.mxu1  ;;  %v145_v47 = vpop.f32.mrf.mxu3 }
  0xa1   :  { %v1606_v48 = vadd.f32 %v130_v46, %v81_v43  ;;  %v1608_v49 = vadd.f32 %v145_v47, %v81_v43 }
  0xa6   :  { %v139_v50 = vpop.f32.mrf.mxu2 }
  0xa7   :  { %v1610_v51 = vadd.f32 %v139_v50, %v81_v43 }
  0xa8   :  { %v133_v52 = vpop.f32.mrf.mxu1  ;;  %v148_v53 = vpop.f32.mrf.mxu3 }
  0xa9   :  { %v1612_v54 = vadd.f32 %v133_v52, %v81_v43  ;;  %v1614_v55 = vadd.f32 %v148_v53, %v81_v43 }
  0xae   :  { %v142_v57 = vpop.f32.mrf.mxu2 }
  0xaf   :  { %v1618_v58 = vadd.f32 %v142_v57, %v81_v43 }
  0xb0   :  { %v168_v59 = vpop.f32.mrf.mxu1  ;;  %v266_v60 = vpop.f32.mrf.mxu3 }
  0xb1   :  { %v169_v61 = vadd.f32 %v168_v59, %v1616_v56 }
  0xb3   :  { %v270_v62 = vadd.f32 %v266_v60, %v169_v61 }
  0xb5   :  { %1226 = vtanh.f32 %v270_v62  ;;  %v1166_v36 = vmul.f32 -1.442695, %v270_v62 }
  0xb6   :  { %v246_v0 = vpop.f32.mrf.mxu2 }
  0xb7   :  { %v269_v2 = vadd.f32 %v246_v0, %v128_v1 }
  0xb8   :  { %v171_v61 = vpop.f32.mrf.mxu1 }
  0xb9   :  { %v1165_v3 = vmul.f32 -1.442695, %v269_v2  ;;  %v172_v62 = vadd.f32 %v171_v61, %v1616_v56 }
  0xbb   :  { %v1227_v63 = vpop.eup %1226  ;;  %1228 = vpow2.f32 %v1165_v3 }
  0xbc   :  { %312 = vrot.lane.b32.xlu0 %v1227_v63, %s1379_s2 }
  0xc1   :  { %v1229_v4 = vpop.eup %1228 }
  0xc2   :  { %v277_v6 = vadd.f32 1.0, %v1229_v4 }
  0xc4   :  { %1230 = vrcp.f32 %v277_v6  ;;  %v290_v15 = vand.u32 2147483648, %v277_v6  ;;  %vm284_vm2 = vweird.f32 %v277_v6  ;;  %v288_v16 = vand.u32 2147483647, %v277_v6 }
  0xc6   :  { %v291_v22 = vor.u32 1.1754944e-38, %v290_v15  ;;  %vm289_vm4 = vcmp.eq.f32.partialorder %v288_v16, 8.507059e+37 }
  0xca   :  { %v1231_v8 = vpop.eup %1230 }
  0xcb   :  { %v280_v10 = vmul.f32 %v1231_v8, %v277_v6  ;;  %vm285_vm1 = vweird.f32 %v1231_v8 }
  0xcc   :  { %vm286_vm3 = vmor %vm284_vm2, %vm285_vm1 }
  0xcd   :  { %v281_v11 = vsub.f32 1.0, %v280_v10 }
  0xcf   :  { %v282_v12 = vmul.f32 %v1231_v8, %v281_v11 }
  0xd1   :  { %v283_v14 = vadd.f32 %v1231_v8, %v282_v12 }
  0xd3   :  { %v287_v18 = vsel %vm286_vm3, %v1231_v8, %v283_v14 }
  0xd4   :  { %v292_v24 = vsel %vm289_vm4, %v291_v22, %v287_v18 }
  0xd5   :  { %v310_v28 = vmul.f32 0.0, %v292_v24 }
 0x12e   :  { %v313_v23 = vpop.permute.xlu0 %312 }
 0x12f   :  { %v315_v27 = vmul.f32 %v313_v23, %v292_v24 }
 0x131   :  { %317 = vrot.lane.b32.xlu0 %v315_v27, %s1379_s2 }
 0x1a3   :  { %v318_v30 = vpop.permute.xlu0 %317 }
 0x1a4   :  { %v1623_v32 = vadd.f32 %v318_v30, %v310_v28 }
 0x1a6   :  { %1232 = vtanh.f32 %v1623_v32 }
 0x1a7   :  { %1234 = vpow2.f32 %v1166_v36 }
 0x1ac   :  { %v1233_v35 = vpop.eup %1232 }
 0x1ad   :  { %323 = vrot.lane.b32.xlu1 %v1233_v35, %s1379_s2  ;;  %v1235_v37 = vpop.eup %1234 }
 0x1ae   :  { %v278_v40 = vadd.f32 1.0, %v1235_v37 }
 0x1b0   :  { %1236 = vrcp.f32 %v278_v40  ;;  %v305_v47 = vand.u32 2147483648, %v278_v40  ;;  %vm299_vm6 = vweird.f32 %v278_v40  ;;  %v303_v50 = vand.u32 2147483647, %v278_v40 }
 0x1b2   :  { %v306_v53 = vor.u32 1.1754944e-38, %v305_v47  ;;  %vm304_vm8 = vcmp.eq.f32.partialorder %v303_v50, 8.507059e+37 }
 0x1b6   :  { %v1237_v41 = vpop.eup %1236 }
 0x1b7   :  { %v295_v42 = vmul.f32 %v1237_v41, %v278_v40  ;;  %vm300_vm5 = vweird.f32 %v1237_v41 }
 0x1b8   :  { %vm301_vm7 = vmor %vm299_vm6, %vm300_vm5 }
 0x1b9   :  { %v296_v43 = vsub.f32 1.0, %v295_v42 }
 0x1bb   :  { %v297_v44 = vmul.f32 %v1237_v41, %v296_v43 }
 0x1bd   :  { %v298_v46 = vadd.f32 %v1237_v41, %v297_v44 }
 0x1bf   :  { %v302_v52 = vsel %vm301_vm7, %v1237_v41, %v298_v46 }
 0x1c0   :  { %v307_v57 = vsel %vm304_vm8, %v306_v53, %v302_v52 }
 0x21f   :  { %v324_v59 = vpop.permute.xlu1 %323 }
 0x220   :  { %v1627_v60 = vmul.f32 %v324_v59, %v307_v57 }
 0x222   :  { %1167 = vmatmul.msk.f32.vlgmr.msra.gmra.mxu2 %vm85_vm0, %v1627_v60  ;;  %1168 = vmatmul.msk.f32.vlgmr.msra.gmra.mxu3 %vm85_vm0, %v1627_v60 }
 0x223   :  { %546 = vmatpush.msra.mxu2 %v1421_v5  ;;  %566 = vmatpush.msra.mxu3 %v1452_v17 }
 0x225   :  { %547 = vmatpush.msra.mxu2 %v1424_v7  ;;  %567 = vmatpush.msra.mxu3 %v1456_v19 }
 0x227   :  { %548 = vmatpush.msra.mxu2 %v1427_v9  ;;  %568 = vmatpush.msra.mxu3 %v1462_v21 }
 0x229   :  { %549 = vmatpush.msra.mxu2 %v1440_v13  ;;  %569 = vmatpush.msra.mxu3 %v1479_v26 }
 0x22b   :  { %550 = vmatpush.msra.mxu2 %v1460_v20  ;;  %570 = vmatpush.msra.mxu3 %v1493_v29 }
 0x22d   :  { %551 = vmatpush.msra.mxu2 %v1477_v25  ;;  %571 = vmatpush.msra.mxu3 %v1498_v31 }
 0x22f   :  { %552 = vmatpush.msra.mxu2 %v1502_v33  ;;  %572 = vmatpush.msra.mxu3 %v1504_v34 }
 0x231   :  { %553 = vmatpush.msra.mxu2 %v1517_v38  ;;  %573 = vmatpush.msra.mxu3 %v1519_v39 }
 0x2a5   :  { %v369_v63 = vpop.f32.mrf.mxu3  ;;  %v349_v2 = vpop.f32.mrf.mxu2 }
 0x2a6   :  { %v373_v0 = vadd.f32 %v369_v63, %v172_v62  ;;  %v372_v3 = vadd.f32 %v349_v2, %v1606_v48  ;;  %v174_v62 = vpop.f32.mrf.mxu1 }
 0x2a7   :  { %v175_v63 = vadd.f32 %v174_v62, %v1616_v56 }
 0x2a8   :  { %1238 = vtanh.f32 %v373_v0  ;;  %v1169_v4 = vmul.f32 -1.442695, %v372_v3  ;;  %v1170_v37 = vmul.f32 -1.442695, %v373_v0 }
 0x2aa   :  { %1240 = vpow2.f32 %v1169_v4 }
 0x2ae   :  { %v1239_v1 = vpop.eup %1238 }
 0x2af   :  { %415 = vrot.lane.b32.xlu1 %v1239_v1, %s1379_s2 }
 0x2b0   :  { %v1241_v6 = vpop.eup %1240 }
 0x2b1   :  { %v380_v8 = vadd.f32 1.0, %v1241_v6 }
 0x2b3   :  { %1242 = vrcp.f32 %v380_v8  ;;  %v393_v16 = vand.u32 2147483648, %v380_v8  ;;  %vm387_vm10 = vweird.f32 %v380_v8  ;;  %v391_v18 = vand.u32 2147483647, %v380_v8 }
 0x2b5   :  { %v394_v23 = vor.u32 1.1754944e-38, %v393_v16  ;;  %vm392_vm12 = vcmp.eq.f32.partialorder %v391_v18, 8.507059e+37 }
 0x2b9   :  { %v1243_v10 = vpop.eup %1242 }
 0x2ba   :  { %v383_v11 = vmul.f32 %v1243_v10, %v380_v8  ;;  %vm388_vm9 = vweird.f32 %v1243_v10 }
 0x2bb   :  { %vm389_vm11 = vmor %vm387_vm10, %vm388_vm9 }
 0x2bc   :  { %v384_v12 = vsub.f32 1.0, %v383_v11 }
 0x2be   :  { %v385_v14 = vmul.f32 %v1243_v10, %v384_v12 }
 0x2c0   :  { %v386_v15 = vadd.f32 %v1243_v10, %v385_v14 }
 0x2c2   :  { %v390_v22 = vsel %vm389_vm11, %v1243_v10, %v386_v15 }
 0x2c3   :  { %v395_v48 = vsel %vm392_vm12, %v394_v23, %v390_v22 }
 0x2c4   :  { %v413_v28 = vmul.f32 %v395_v48, %v1623_v32 }
 0x321   :  { %v416_v24 = vpop.permute.xlu1 %415 }
 0x322   :  { %v418_v27 = vmul.f32 %v416_v24, %v395_v48 }
 0x324   :  { %420 = vrot.lane.b32.xlu2 %v418_v27, %s1379_s2 }
 0x37e   :  { %v421_v30 = vpop.permute.xlu2 %420 }
 0x37f   :  { %v1654_v35 = vadd.f32 %v421_v30, %v413_v28 }
 0x381   :  { %1244 = vtanh.f32 %v1654_v35 }
 0x382   :  { %1246 = vpow2.f32 %v1170_v37 }
 0x387   :  { %v1245_v36 = vpop.eup %1244 }
 0x388   :  { %426 = vrot.lane.b32.xlu2 %v1245_v36, %s1379_s2  ;;  %v1247_v40 = vpop.eup %1246 }
 0x389   :  { %v381_v41 = vadd.f32 1.0, %v1247_v40 }
 0x38b   :  { %1248 = vrcp.f32 %v381_v41  ;;  %v408_v32 = vand.u32 2147483648, %v381_v41  ;;  %vm402_vm14 = vweird.f32 %v381_v41  ;;  %v406_v50 = vand.u32 2147483647, %v381_v41 }
 0x38d   :  { %v409_v53 = vor.u32 1.1754944e-38, %v408_v32  ;;  %vm407_vm1 = vcmp.eq.f32.partialorder %v406_v50, 8.507059e+37 }
 0x391   :  { %v1249_v42 = vpop.eup %1248 }
 0x392   :  { %v398_v43 = vmul.f32 %v1249_v42, %v381_v41  ;;  %vm403_vm13 = vweird.f32 %v1249_v42 }
 0x393   :  { %vm404_vm15 = vmor %vm402_vm14, %vm403_vm13 }
 0x394   :  { %v399_v44 = vsub.f32 1.0, %v398_v43 }
 0x396   :  { %v400_v46 = vmul.f32 %v1249_v42, %v399_v44 }
 0x398   :  { %v401_v47 = vadd.f32 %v1249_v42, %v400_v46 }
 0x39a   :  { %v405_v52 = vsel %vm404_vm15, %v1249_v42, %v401_v47 }
 0x39b   :  { %v410_v57 = vsel %vm407_vm1, %v409_v53, %v405_v52 }
 0x3e2   :  { %v427_v59 = vpop.permute.xlu2 %426 }
 0x3e3   :  { %v1658_v61 = vmul.f32 %v427_v59, %v410_v57 }
 0x3e5   :  { %1171 = vmatmul.msk.f32.vlgmr.msrb.gmra.mxu2 %vm85_vm0, %v1658_v61  ;;  %1172 = vmatmul.msk.f32.vlgmr.msrb.gmra.mxu3 %vm85_vm0, %v1658_v61 }
 0x3e6   :  { %752 = vmatpush.msrb.mxu2 %v1421_v5  ;;  %772 = vmatpush.msrb.mxu3 %v1452_v17 }
 0x3e8   :  { %753 = vmatpush.msrb.mxu2 %v1424_v7  ;;  %773 = vmatpush.msrb.mxu3 %v1456_v19 }
 0x3ea   :  { %754 = vmatpush.msrb.mxu2 %v1427_v9  ;;  %774 = vmatpush.msrb.mxu3 %v1462_v21 }
 0x3ec   :  { %755 = vmatpush.msrb.mxu2 %v1440_v13  ;;  %775 = vmatpush.msrb.mxu3 %v1479_v26 }
 0x3ee   :  { %756 = vmatpush.msrb.mxu2 %v1460_v20  ;;  %776 = vmatpush.msrb.mxu3 %v1493_v29 }
 0x3f0   :  { %757 = vmatpush.msrb.mxu2 %v1477_v25  ;;  %777 = vmatpush.msrb.mxu3 %v1498_v31 }
 0x3f2   :  { %758 = vmatpush.msrb.mxu2 %v1502_v33  ;;  %778 = vmatpush.msrb.mxu3 %v1504_v34 }
 0x3f4   :  { %759 = vmatpush.msrb.mxu2 %v1517_v38  ;;  %779 = vmatpush.msrb.mxu3 %v1519_v39 }
 0x468   :  { %v472_v0 = vpop.f32.mrf.mxu3  ;;  %v452_v3 = vpop.f32.mrf.mxu2 }
 0x469   :  { %v476_v1 = vadd.f32 %v472_v0, %v175_v63  ;;  %v475_v4 = vadd.f32 %v452_v3, %v1612_v54 }
 0x46b   :  { %1250 = vtanh.f32 %v476_v1  ;;  %v1173_v6 = vmul.f32 -1.442695, %v475_v4  ;;  %v1174_v40 = vmul.f32 -1.442695, %v476_v1 }
 0x46d   :  { %1252 = vpow2.f32 %v1173_v6 }
 0x471   :  { %v1251_v2 = vpop.eup %1250 }
 0x472   :  { %518 = vrot.lane.b32.xlu0 %v1251_v2, %s1379_s2 }
 0x473   :  { %v1253_v8 = vpop.eup %1252 }
 0x474   :  { %v483_v10 = vadd.f32 1.0, %v1253_v8 }
 0x476   :  { %1254 = vrcp.f32 %v483_v10  ;;  %v496_v18 = vand.u32 2147483648, %v483_v10  ;;  %vm490_vm3 = vweird.f32 %v483_v10  ;;  %v494_v22 = vand.u32 2147483647, %v483_v10 }
 0x478   :  { %v497_v24 = vor.u32 1.1754944e-38, %v496_v18  ;;  %vm495_vm5 = vcmp.eq.f32.partialorder %v494_v22, 8.507059e+37 }
 0x47c   :  { %v1255_v11 = vpop.eup %1254 }
 0x47d   :  { %v486_v12 = vmul.f32 %v1255_v11, %v483_v10  ;;  %vm491_vm2 = vweird.f32 %v1255_v11 }
 0x47e   :  { %vm492_vm4 = vmor %vm490_vm3, %vm491_vm2 }
 0x47f   :  { %v487_v14 = vsub.f32 1.0, %v486_v12 }
 0x481   :  { %v488_v15 = vmul.f32 %v1255_v11, %v487_v14 }
 0x483   :  { %v489_v16 = vadd.f32 %v1255_v11, %v488_v15 }
 0x485   :  { %v493_v23 = vsel %vm492_vm4, %v1255_v11, %v489_v16 }
 0x486   :  { %v498_v54 = vsel %vm495_vm5, %v497_v24, %v493_v23 }
 0x487   :  { %v516_v28 = vmul.f32 %v498_v54, %v1654_v35 }
 0x4e4   :  { %v519_v48 = vpop.permute.xlu0 %518 }
 0x4e5   :  { %v521_v27 = vmul.f32 %v519_v48, %v498_v54 }
 0x4e7   :  { %523 = vrot.lane.b32.xlu1 %v521_v27, %s1379_s2 }
 0x559   :  { %v524_v30 = vpop.permute.xlu1 %523 }
 0x55a   :  { %v1685_v36 = vadd.f32 %v524_v30, %v516_v28 }
 0x55c   :  { %1256 = vtanh.f32 %v1685_v36 }
 0x55d   :  { %1258 = vpow2.f32 %v1174_v40 }
 0x562   :  { %v1257_v37 = vpop.eup %1256 }
 0x563   :  { %529 = vrot.lane.b32.xlu2 %v1257_v37, %s1379_s2  ;;  %v1259_v41 = vpop.eup %1258 }
 0x564   :  { %v484_v42 = vadd.f32 1.0, %v1259_v41 }
 0x566   :  { %1260 = vrcp.f32 %v484_v42  ;;  %v511_v35 = vand.u32 2147483648, %v484_v42  ;;  %vm505_vm7 = vweird.f32 %v484_v42  ;;  %v509_v50 = vand.u32 2147483647, %v484_v42 }
 0x568   :  { %v512_v53 = vor.u32 1.1754944e-38, %v511_v35  ;;  %vm510_vm9 = vcmp.eq.f32.partialorder %v509_v50, 8.507059e+37 }
 0x56c   :  { %v1261_v43 = vpop.eup %1260 }
 0x56d   :  { %v501_v44 = vmul.f32 %v1261_v43, %v484_v42  ;;  %vm506_vm6 = vweird.f32 %v1261_v43 }
 0x56e   :  { %vm507_vm8 = vmor %vm505_vm7, %vm506_vm6 }
 0x56f   :  { %v502_v46 = vsub.f32 1.0, %v501_v44 }
 0x571   :  { %v503_v47 = vmul.f32 %v1261_v43, %v502_v46 }
 0x573   :  { %v504_v32 = vadd.f32 %v1261_v43, %v503_v47 }
 0x575   :  { %v508_v52 = vsel %vm507_vm8, %v1261_v43, %v504_v32 }
 0x576   :  { %v513_v57 = vsel %vm510_vm9, %v512_v53, %v508_v52 }
 0x5bd   :  { %v530_v59 = vpop.permute.xlu2 %529 }
 0x5be   :  { %v1689_v62 = vmul.f32 %v530_v59, %v513_v57 }
 0x5c0   :  { %1175 = vmatmul.msk.f32.vlgmr.msra.gmra.mxu2 %vm85_vm0, %v1689_v62  ;;  %1176 = vmatmul.msk.f32.vlgmr.msra.gmra.mxu3 %vm85_vm0, %v1689_v62 }
 0x5c1   :  { %958 = vmatpush.msra.mxu2 %v1421_v5  ;;  %978 = vmatpush.msra.mxu3 %v1452_v17  ;;  %v177_v5 = vpop.f32.mrf.mxu1 }
 0x5c3   :  { %959 = vmatpush.msra.mxu2 %v1424_v7  ;;  %979 = vmatpush.msra.mxu3 %v1456_v19  ;;  %v178_v7 = vadd.f32 %v177_v5, %v1616_v56 }
 0x5c5   :  { %960 = vmatpush.msra.mxu2 %v1427_v9  ;;  %980 = vmatpush.msra.mxu3 %v1462_v21 }
 0x5c7   :  { %961 = vmatpush.msra.mxu2 %v1440_v13  ;;  %981 = vmatpush.msra.mxu3 %v1479_v26 }
 0x5c9   :  { %962 = vmatpush.msra.mxu2 %v1460_v20  ;;  %982 = vmatpush.msra.mxu3 %v1493_v29  ;;  %v180_v37 = vpop.f32.mrf.mxu1 }
 0x5ca   :  { %v181_v43 = vadd.f32 %v180_v37, %v1616_v56 }
 0x5cb   :  { %963 = vmatpush.msra.mxu2 %v1477_v25  ;;  %983 = vmatpush.msra.mxu3 %v1498_v31 }
 0x5cd   :  { %964 = vmatpush.msra.mxu2 %v1502_v33  ;;  %984 = vmatpush.msra.mxu3 %v1504_v34 }
 0x5cf   :  { %965 = vmatpush.msra.mxu2 %v1517_v38  ;;  %985 = vmatpush.msra.mxu3 %v1519_v39 }
 0x5d1   :  { %v183_v40 = vpop.f32.mrf.mxu1 }
 0x5d9   :  { %v1723_v41 = vpop.f32.mrf.mxu1 }
 0x5e1   :  { %v1725_v42 = vpop.f32.mrf.mxu1 }
 0x643   :  { %v575_v9 = vpop.f32.mrf.mxu3  ;;  %v555_v19 = vpop.f32.mrf.mxu2 }
 0x644   :  { %v579_v13 = vadd.f32 %v575_v9, %v178_v7  ;;  %v578_v20 = vadd.f32 %v555_v19, %v1604_v45 }
 0x646   :  { %1262 = vtanh.f32 %v579_v13  ;;  %v1177_v21 = vmul.f32 -1.442695, %v578_v20  ;;  %v1178_v11 = vmul.f32 -1.442695, %v579_v13 }
 0x648   :  { %1264 = vpow2.f32 %v1177_v21 }
 0x64c   :  { %v1263_v17 = vpop.eup %1262 }
 0x64d   :  { %621 = vrot.lane.b32.xlu0 %v1263_v17, %s1379_s2 }
 0x64e   :  { %v1265_v25 = vpop.eup %1264 }
 0x64f   :  { %v586_v26 = vadd.f32 1.0, %v1265_v25 }
 0x651   :  { %1266 = vrcp.f32 %v586_v26  ;;  %v599_v39 = vand.u32 2147483648, %v586_v26  ;;  %vm593_vm11 = vweird.f32 %v586_v26  ;;  %v597_v63 = vand.u32 2147483647, %v586_v26 }
 0x653   :  { %v600_v1 = vor.u32 1.1754944e-38, %v599_v39  ;;  %vm598_vm13 = vcmp.eq.f32.partialorder %v597_v63, 8.507059e+37 }
 0x657   :  { %v1267_v29 = vpop.eup %1266 }
 0x658   :  { %v589_v31 = vmul.f32 %v1267_v29, %v586_v26  ;;  %vm594_vm10 = vweird.f32 %v1267_v29 }
 0x659   :  { %vm595_vm12 = vmor %vm593_vm11, %vm594_vm10 }
 0x65a   :  { %v590_v33 = vsub.f32 1.0, %v589_v31 }
 0x65c   :  { %v591_v34 = vmul.f32 %v1267_v29, %v590_v33 }
 0x65e   :  { %v592_v38 = vadd.f32 %v1267_v29, %v591_v34 }
 0x660   :  { %v596_v0 = vsel %vm595_vm12, %v1267_v29, %v592_v38 }
 0x661   :  { %v601_v45 = vsel %vm598_vm13, %v600_v1, %v596_v0 }
 0x662   :  { %v619_v4 = vmul.f32 %v601_v45, %v1685_v36 }
 0x6bf   :  { %v622_v2 = vpop.permute.xlu0 %621 }
 0x6c0   :  { %v624_v3 = vmul.f32 %v622_v2, %v601_v45 }
 0x6c2   :  { %626 = vrot.lane.b32.xlu1 %v624_v3, %s1379_s2 }
 0x734   :  { %v627_v6 = vpop.permute.xlu1 %626 }
 0x735   :  { %v629_v8 = vadd.f32 %v627_v6, %v619_v4 }
 0x737   :  { %1268 = vtanh.f32 %v629_v8 }
 0x738   :  { %1270 = vpow2.f32 %v1178_v11 }
 0x73d   :  { %v1269_v10 = vpop.eup %1268 }
 0x73e   :  { %632 = vrot.lane.b32.xlu2 %v1269_v10, %s1379_s2  ;;  %v1271_v12 = vpop.eup %1270 }
 0x73f   :  { %v587_v14 = vadd.f32 1.0, %v1271_v12 }
 0x741   :  { %1272 = vrcp.f32 %v587_v14  ;;  %v614_v24 = vand.u32 2147483648, %v587_v14  ;;  %vm608_vm15 = vweird.f32 %v587_v14  ;;  %v612_v48 = vand.u32 2147483647, %v587_v14 }
 0x743   :  { %v615_v27 = vor.u32 1.1754944e-38, %v614_v24  ;;  %vm613_vm2 = vcmp.eq.f32.partialorder %v612_v48, 8.507059e+37 }
 0x747   :  { %v1273_v15 = vpop.eup %1272 }
 0x748   :  { %v604_v16 = vmul.f32 %v1273_v15, %v587_v14  ;;  %vm609_vm14 = vweird.f32 %v1273_v15  ;;  %v184_v14 = vadd.f32 %v183_v40, %v1616_v56 }
 0x749   :  { %vm610_vm1 = vmor %vm608_vm15, %vm609_vm14 }
 0x74a   :  { %v605_v18 = vsub.f32 1.0, %v604_v16 }
 0x74c   :  { %v606_v22 = vmul.f32 %v1273_v15, %v605_v18 }
 0x74e   :  { %v607_v23 = vadd.f32 %v1273_v15, %v606_v22 }
 0x750   :  { %v611_v54 = vsel %vm610_vm1, %v1273_v15, %v607_v23 }
 0x751   :  { %v616_v28 = vsel %vm613_vm2, %v615_v27, %v611_v54 }
 0x798   :  { %v633_v30 = vpop.permute.xlu2 %632 }
 0x799   :  { %v1717_v36 = vmul.f32 %v633_v30, %v616_v28 }
 0x79b   :  { %1179 = vmatmul.msk.f32.vlgmr.msra.gmra.mxu0 %vm85_vm0, %v1717_v36  ;;  %1180 = vmatmul.msk.f32.vlgmr.msra.gmra.mxu1 %vm85_vm0, %v1717_v36 }
 0x818   :  { %v678_v44 = vpop.f32.mrf.mxu1  ;;  %v658_v32 = vpop.f32.mrf.mxu0 }
 0x819   :  { %v682_v46 = vadd.f32 %v678_v44, %v181_v43  ;;  %v681_v35 = vadd.f32 %v658_v32, %v1610_v51 }
 0x81b   :  { %1274 = vtanh.f32 %v682_v46  ;;  %v1181_v50 = vmul.f32 -1.442695, %v681_v35  ;;  %v1182_v34 = vmul.f32 -1.442695, %v682_v46 }
 0x81d   :  { %1276 = vpow2.f32 %v1181_v50 }
 0x821   :  { %v1275_v47 = vpop.eup %1274 }
 0x822   :  { %724 = vrot.lane.b32.xlu0 %v1275_v47, %s1379_s2 }
 0x823   :  { %v1277_v52 = vpop.eup %1276 }
 0x824   :  { %v689_v53 = vadd.f32 1.0, %v1277_v52 }
 0x826   :  { %1278 = vrcp.f32 %v689_v53  ;;  %v702_v13 = vand.u32 2147483648, %v689_v53  ;;  %vm696_vm4 = vweird.f32 %v689_v53  ;;  %v700_v17 = vand.u32 2147483647, %v689_v53 }
 0x828   :  { %v703_v20 = vor.u32 1.1754944e-38, %v702_v13  ;;  %vm701_vm6 = vcmp.eq.f32.partialorder %v700_v17, 8.507059e+37 }
 0x82c   :  { %v1279_v57 = vpop.eup %1278 }
 0x82d   :  { %v692_v59 = vmul.f32 %v1279_v57, %v689_v53  ;;  %vm697_vm3 = vweird.f32 %v1279_v57 }
 0x82e   :  { %vm698_vm5 = vmor %vm696_vm4, %vm697_vm3 }
 0x82f   :  { %v693_v5 = vsub.f32 1.0, %v692_v59 }
 0x831   :  { %v694_v7 = vmul.f32 %v1279_v57, %v693_v5 }
 0x833   :  { %v695_v9 = vadd.f32 %v1279_v57, %v694_v7 }
 0x835   :  { %v699_v19 = vsel %vm698_vm5, %v1279_v57, %v695_v9 }
 0x836   :  { %v704_v51 = vsel %vm701_vm6, %v703_v20, %v699_v19 }
 0x837   :  { %v722_v26 = vmul.f32 %v704_v51, %v629_v8 }
 0x894   :  { %v725_v21 = vpop.permute.xlu0 %724 }
 0x895   :  { %v727_v25 = vmul.f32 %v725_v21, %v704_v51 }
 0x897   :  { %729 = vrot.lane.b32.xlu1 %v727_v25, %s1379_s2 }
 0x909   :  { %v730_v29 = vpop.permute.xlu1 %729 }
 0x90a   :  { %v732_v31 = vadd.f32 %v730_v29, %v722_v26 }
 0x90c   :  { %1280 = vtanh.f32 %v732_v31 }
 0x90d   :  { %1282 = vpow2.f32 %v1182_v34  ;;  %v187_v34 = vadd.f32 %v1723_v41, %v1616_v56 }
 0x912   :  { %v1281_v33 = vpop.eup %1280 }
 0x913   :  { %735 = vrot.lane.b32.xlu2 %v1281_v33, %s1379_s2  ;;  %v1283_v38 = vpop.eup %1282 }
 0x914   :  { %v690_v39 = vadd.f32 1.0, %v1283_v38 }
 0x916   :  { %1284 = vrcp.f32 %v690_v39  ;;  %v717_v3 = vand.u32 2147483648, %v690_v39  ;;  %vm711_vm8 = vweird.f32 %v690_v39  ;;  %v715_v4 = vand.u32 2147483647, %v690_v39 }
 0x918   :  { %v718_v8 = vor.u32 1.1754944e-38, %v717_v3  ;;  %vm716_vm10 = vcmp.eq.f32.partialorder %v715_v4, 8.507059e+37 }
 0x91c   :  { %v1285_v63 = vpop.eup %1284 }
 0x91d   :  { %v707_v0 = vmul.f32 %v1285_v63, %v690_v39  ;;  %vm712_vm7 = vweird.f32 %v1285_v63 }
 0x91e   :  { %vm713_vm9 = vmor %vm711_vm8, %vm712_vm7 }
 0x91f   :  { %v708_v1 = vsub.f32 1.0, %v707_v0 }
 0x921   :  { %v709_v2 = vmul.f32 %v1285_v63, %v708_v1 }
 0x923   :  { %v710_v45 = vadd.f32 %v1285_v63, %v709_v2 }
 0x925   :  { %v714_v6 = vsel %vm713_vm9, %v1285_v63, %v710_v45 }
 0x926   :  { %v719_v10 = vsel %vm716_vm10, %v718_v8, %v714_v6 }
 0x96d   :  { %v736_v11 = vpop.permute.xlu2 %735 }
 0x96e   :  { %v1732_v12 = vmul.f32 %v736_v11, %v719_v10 }
 0x970   :  { %1183 = vmatmul.msk.f32.vlgmr.msrb.gmra.mxu2 %vm85_vm0, %v1732_v12  ;;  %1184 = vmatmul.msk.f32.vlgmr.msrb.gmra.mxu3 %vm85_vm0, %v1732_v12 }
 0x9f3   :  { %v781_v15 = vpop.f32.mrf.mxu3  ;;  %v761_v22 = vpop.f32.mrf.mxu2 }
 0x9f4   :  { %v785_v16 = vadd.f32 %v781_v15, %v184_v14  ;;  %v784_v23 = vadd.f32 %v761_v22, %v1618_v58 }
 0x9f6   :  { %1286 = vtanh.f32 %v785_v16  ;;  %v1185_v24 = vmul.f32 -1.442695, %v784_v23  ;;  %v1186_v59 = vmul.f32 -1.442695, %v785_v16 }
 0x9f8   :  { %1288 = vpow2.f32 %v1185_v24 }
 0x9fc   :  { %v1287_v18 = vpop.eup %1286 }
 0x9fd   :  { %827 = vrot.lane.b32.xlu0 %v1287_v18, %s1379_s2 }
 0x9fe   :  { %v1289_v48 = vpop.eup %1288 }
 0x9ff   :  { %v792_v54 = vadd.f32 1.0, %v1289_v48 }
 0xa01   :  { %1290 = vrcp.f32 %v792_v54  ;;  %v805_v40 = vand.u32 2147483648, %v792_v54  ;;  %vm799_vm12 = vweird.f32 %v792_v54  ;;  %v803_v44 = vand.u32 2147483647, %v792_v54 }
 0xa03   :  { %v806_v47 = vor.u32 1.1754944e-38, %v805_v40  ;;  %vm804_vm14 = vcmp.eq.f32.partialorder %v803_v44, 8.507059e+37 }
 0xa07   :  { %v1291_v27 = vpop.eup %1290 }
 0xa08   :  { %v795_v28 = vmul.f32 %v1291_v27, %v792_v54  ;;  %vm800_vm11 = vweird.f32 %v1291_v27 }
 0xa09   :  { %vm801_vm13 = vmor %vm799_vm12, %vm800_vm11 }
 0xa0a   :  { %v796_v30 = vsub.f32 1.0, %v795_v28 }
 0xa0c   :  { %v797_v37 = vmul.f32 %v1291_v27, %v796_v30 }
 0xa0e   :  { %v798_v43 = vadd.f32 %v1291_v27, %v797_v37 }
 0xa10   :  { %v802_v46 = vsel %vm801_vm13, %v1291_v27, %v798_v43 }
 0xa11   :  { %v807_v58 = vsel %vm804_vm14, %v806_v47, %v802_v46 }
 0xa12   :  { %v825_v50 = vmul.f32 %v807_v58, %v732_v31 }
 0xa6f   :  { %v828_v32 = vpop.permute.xlu0 %827 }
 0xa70   :  { %v830_v35 = vmul.f32 %v828_v32, %v807_v58 }
 0xa72   :  { %832 = vrot.lane.b32.xlu1 %v830_v35, %s1379_s2 }
 0xae4   :  { %v833_v52 = vpop.permute.xlu1 %832 }
 0xae5   :  { %v835_v53 = vadd.f32 %v833_v52, %v825_v50 }
 0xae7   :  { %1292 = vtanh.f32 %v835_v53 }
 0xae8   :  { %1294 = vpow2.f32 %v1186_v59 }
 0xaed   :  { %v1293_v57 = vpop.eup %1292 }
 0xaee   :  { %838 = vrot.lane.b32.xlu2 %v1293_v57, %s1379_s2  ;;  %v1295_v5 = vpop.eup %1294  ;;  %v190_v57 = vadd.f32 %v1725_v42, %v1616_v56 }
 0xaef   :  { %v793_v7 = vadd.f32 1.0, %v1295_v5 }
 0xaf1   :  { %1296 = vrcp.f32 %v793_v7  ;;  %v820_v21 = vand.u32 2147483648, %v793_v7  ;;  %vm814_vm1 = vweird.f32 %v793_v7  ;;  %v818_v51 = vand.u32 2147483647, %v793_v7 }
 0xaf3   :  { %v821_v26 = vor.u32 1.1754944e-38, %v820_v21  ;;  %vm819_vm3 = vcmp.eq.f32.partialorder %v818_v51, 8.507059e+37 }
 0xaf7   :  { %v1297_v9 = vpop.eup %1296 }
 0xaf8   :  { %v810_v13 = vmul.f32 %v1297_v9, %v793_v7  ;;  %vm815_vm15 = vweird.f32 %v1297_v9 }
 0xaf9   :  { %vm816_vm2 = vmor %vm814_vm1, %vm815_vm15 }
 0xafa   :  { %v811_v17 = vsub.f32 1.0, %v810_v13 }
 0xafc   :  { %v812_v19 = vmul.f32 %v1297_v9, %v811_v17 }
 0xafe   :  { %v813_v20 = vadd.f32 %v1297_v9, %v812_v19 }
 0xb00   :  { %v817_v25 = vsel %vm816_vm2, %v1297_v9, %v813_v20 }
 0xb01   :  { %v822_v29 = vsel %vm819_vm3, %v821_v26, %v817_v25 }
 0xb48   :  { %v839_v31 = vpop.permute.xlu2 %838 }
 0xb49   :  { %v1743_v33 = vmul.f32 %v839_v31, %v822_v29 }
 0xb4b   :  { %1187 = vmatmul.msk.f32.vlgmr.msrb.gmra.mxu0 %vm85_vm0, %v1743_v33  ;;  %1188 = vmatmul.msk.f32.vlgmr.msrb.gmra.mxu1 %vm85_vm0, %v1743_v33 }
 0xbc8   :  { %v884_v38 = vpop.f32.mrf.mxu1  ;;  %v864_v0 = vpop.f32.mrf.mxu0 }
 0xbc9   :  { %v888_v39 = vadd.f32 %v884_v38, %v187_v34  ;;  %v887_v1 = vadd.f32 %v864_v0, %v1608_v49  ;;  %v1063_v0 = vld [vmem:[%s1856_s4 + $0x30] sm:$0xff] }
 0xbcb   :  { %1298 = vtanh.f32 %v888_v39  ;;  %v1189_v2 = vmul.f32 -1.442695, %v887_v1  ;;  %v1190_v27 = vmul.f32 -1.442695, %v888_v39  ;;  %v1062_v1 = vld [vmem:[%s1856_s4 + $0x28] sm:$0xff] }
 0xbcd   :  { %1300 = vpow2.f32 %v1189_v2  ;;  %v1061_v2 = vld [vmem:[%s1856_s4 + $0x20] sm:$0xff] }
 0xbd1   :  { %v1299_v63 = vpop.eup %1298 }
 0xbd2   :  { %930 = vrot.lane.b32.xlu0 %v1299_v63, %s1379_s2  ;;  %v1064_v63 = vld [vmem:[%s1856_s4 + $0x38] sm:$0xff] }
 0xbd3   :  { %v1301_v45 = vpop.eup %1300  ;;  %1101 = vmatpush.msra.mxu0 %v1064_v63 }
 0xbd4   :  { %v895_v3 = vadd.f32 1.0, %v1301_v45  ;;  %v1060_v45 = vld [vmem:[%s1856_s4 + $0x18] sm:$0xff] }
 0xbd5   :  { %1102 = vmatpush.msra.mxu0 %v1063_v0 }
 0xbd6   :  { %1302 = vrcp.f32 %v895_v3  ;;  %v908_v41 = vand.u32 2147483648, %v895_v3  ;;  %vm902_vm5 = vweird.f32 %v895_v3  ;;  %v906_v14 = vand.u32 2147483647, %v895_v3 }
 0xbd7   :  { %1103 = vmatpush.msra.mxu0 %v1062_v1 }
 0xbd8   :  { %v909_v16 = vor.u32 1.1754944e-38, %v908_v41  ;;  %vm907_vm7 = vcmp.eq.f32.partialorder %v906_v14, 8.507059e+37 }
 0xbd9   :  { %1104 = vmatpush.msra.mxu0 %v1061_v2 }
 0xbdb   :  { %1105 = vmatpush.msra.mxu0 %v1060_v45 }
 0xbdc   :  { %v1303_v4 = vpop.eup %1302 }
 0xbdd   :  { %v898_v6 = vmul.f32 %v1303_v4, %v895_v3  ;;  %vm903_vm4 = vweird.f32 %v1303_v4  ;;  %v1059_v3 = vld [vmem:[%s1856_s4 + $0x10] sm:$0xff] }
 0xbde   :  { %vm904_vm6 = vmor %vm902_vm5, %vm903_vm4  ;;  %1106 = vmatpush.msra.mxu0 %v1059_v3  ;;  %vm1048_vm5 = vcmask 261120  }
 0xbdf   :  { %v899_v8 = vsub.f32 1.0, %v898_v6 }
 0xbe1   :  { %v900_v10 = vmul.f32 %v1303_v4, %v899_v8 }
 0xbe3   :  { %v901_v11 = vadd.f32 %v1303_v4, %v900_v10 }
 0xbe5   :  { %v905_v15 = vsel %vm904_vm6, %v1303_v4, %v901_v11  ;;  %vm1134_vm6 = vcmask 130048  }
 0xbe6   :  { %v910_v49 = vsel %vm907_vm7, %v909_v16, %v905_v15  ;;  %v1058_v15 = vld [vmem:[%s1856_s4 + $0x8] sm:$0xff]  ;;  %v1057_v16 = vld [vmem:[%s1856_s4] sm:$0xff] }
 0xbe7   :  { %v928_v23 = vmul.f32 %v910_v49, %v835_v53  ;;  %1107 = vmatpush.msra.mxu0 %v1058_v15 }
 0xbe9   :  { %1108 = vmatpush.msra.mxu0 %v1057_v16 }
 0xc44   :  { %v931_v18 = vpop.permute.xlu0 %930 }
 0xc45   :  { %v933_v22 = vmul.f32 %v931_v18, %v910_v49 }
 0xc47   :  { %935 = vrot.lane.b32.xlu1 %v933_v22, %s1379_s2 }
 0xcb9   :  { %v936_v24 = vpop.permute.xlu1 %935 }
 0xcba   :  { %v1754_v48 = vadd.f32 %v936_v24, %v928_v23 }
 0xcbc   :  { %1304 = vtanh.f32 %v1754_v48 }
 0xcbd   :  { %1306 = vpow2.f32 %v1190_v27 }
 0xcc2   :  { %v1305_v54 = vpop.eup %1304 }
 0xcc3   :  { %941 = vrot.lane.b32.xlu2 %v1305_v54, %s1379_s2  ;;  %v1307_v28 = vpop.eup %1306 }
 0xcc4   :  { %v896_v30 = vadd.f32 1.0, %v1307_v28 }
 0xcc6   :  { %1308 = vrcp.f32 %v896_v30  ;;  %v923_v47 = vand.u32 2147483648, %v896_v30  ;;  %vm917_vm9 = vweird.f32 %v896_v30  ;;  %v921_v32 = vand.u32 2147483647, %v896_v30 }
 0xcc8   :  { %v924_v35 = vor.u32 1.1754944e-38, %v923_v47  ;;  %vm922_vm11 = vcmp.eq.f32.partialorder %v921_v32, 8.507059e+37  ;;  %v1052_v47 = vsel %vm1048_vm5, %v1717_v36, %v1732_v12  ;;  %v1053_v32 = vsel %vm1048_vm5, %v1732_v12, %v1717_v36  ;;  %v1225_v36 = vld [vmem:[%s1857_s5] ss:$0 sm:$0xff] }
 0xccc   :  { %v1309_v37 = vpop.eup %1308 }
 0xccd   :  { %v913_v43 = vmul.f32 %v1309_v37, %v896_v30  ;;  %vm918_vm8 = vweird.f32 %v1309_v37 }
 0xcce   :  { %vm919_vm10 = vmor %vm917_vm9, %vm918_vm8 }
 0xccf   :  { %v914_v40 = vsub.f32 1.0, %v913_v43 }
 0xcd1   :  { %v915_v44 = vmul.f32 %v1309_v37, %v914_v40 }
 0xcd3   :  { %v916_v46 = vadd.f32 %v1309_v37, %v915_v44 }
 0xcd5   :  { %v920_v58 = vsel %vm919_vm10, %v1309_v37, %v916_v46  ;;  %v1051_v46 = vsel %vm1048_vm5, %v1689_v62, %v1743_v33 }
 0xcd6   :  { %v925_v50 = vsel %vm922_vm11, %v924_v35, %v920_v58  ;;  %v1054_v58 = vsel %vm1048_vm5, %v1743_v33, %v1689_v62 }
 0xd1d   :  { %v942_v52 = vpop.permute.xlu2 %941 }
 0xd1e   :  { %v1758_v53 = vmul.f32 %v942_v52, %v925_v50 }
 0xd20   :  { %1191 = vmatmul.msk.f32.vlgmr.msra.gmra.mxu2 %vm85_vm0, %v1758_v53  ;;  %1192 = vmatmul.msk.f32.vlgmr.msra.gmra.mxu3 %vm85_vm0, %v1758_v53  ;;  %v1050_v44 = vsel %vm1048_vm5, %v1658_v61, %v1758_v53  ;;  %v1055_v35 = vsel %vm1048_vm5, %v1758_v53, %v1658_v61 }
 0xda3   :  { %v987_v59 = vpop.f32.mrf.mxu3  ;;  %v967_v9 = vpop.f32.mrf.mxu2 }
 0xda4   :  { %v991_v5 = vadd.f32 %v987_v59, %v190_v57  ;;  %v990_v13 = vadd.f32 %v967_v9, %v1614_v55 }
 0xda6   :  { %1310 = vtanh.f32 %v991_v5  ;;  %v1193_v17 = vmul.f32 -1.442695, %v990_v13  ;;  %v1194_v11 = vmul.f32 -1.442695, %v991_v5 }
 0xda8   :  { %1312 = vpow2.f32 %v1193_v17 }
 0xdac   :  { %v1311_v7 = vpop.eup %1310 }
 0xdad   :  { %1033 = vrot.lane.b32.xlu0 %v1311_v7, %s1379_s2 }
 0xdae   :  { %v1313_v19 = vpop.eup %1312 }
 0xdaf   :  { %v998_v20 = vadd.f32 1.0, %v1313_v19 }
 0xdb1   :  { %1314 = vrcp.f32 %v998_v20  ;;  %v1011_v56 = vand.u32 2147483648, %v998_v20  ;;  %vm1005_vm13 = vweird.f32 %v998_v20  ;;  %v1009_v42 = vand.u32 2147483647, %v998_v20 }
 0xdb3   :  { %v1012_v34 = vor.u32 1.1754944e-38, %v1011_v56  ;;  %vm1010_vm15 = vcmp.eq.f32.partialorder %v1009_v42, 8.507059e+37 }
 0xdb7   :  { %v1315_v21 = vpop.eup %1314 }
 0xdb8   :  { %v1001_v51 = vmul.f32 %v1315_v21, %v998_v20  ;;  %vm1006_vm12 = vweird.f32 %v1315_v21 }
 0xdb9   :  { %vm1007_vm14 = vmor %vm1005_vm13, %vm1006_vm12 }
 0xdba   :  { %v1002_v25 = vsub.f32 1.0, %v1001_v51 }
 0xdbc   :  { %v1003_v26 = vmul.f32 %v1315_v21, %v1002_v25 }
 0xdbe   :  { %v1004_v29 = vadd.f32 %v1315_v21, %v1003_v26 }
 0xdc0   :  { %v1008_v31 = vsel %vm1007_vm14, %v1315_v21, %v1004_v29 }
 0xdc1   :  { %v1013_v55 = vsel %vm1010_vm15, %v1012_v34, %v1008_v31 }
 0xdc2   :  { %v1031_v4 = vmul.f32 %v1013_v55, %v1754_v48 }
 0xe1f   :  { %v1034_v38 = vpop.permute.xlu0 %1033 }
 0xe20   :  { %v1036_v39 = vmul.f32 %v1034_v38, %v1013_v55 }
 0xe22   :  { %1038 = vrot.lane.b32.xlu1 %v1036_v39, %s1379_s2 }
 0xe94   :  { %v1039_v6 = vpop.permute.xlu1 %1038 }
 0xe95   :  { %v1041_v8 = vadd.f32 %v1039_v6, %v1031_v4 }
 0xe97   :  { %1316 = vtanh.f32 %v1041_v8 }
 0xe98   :  { %1318 = vpow2.f32 %v1194_v11 }
 0xe9d   :  { %v1317_v10 = vpop.eup %1316 }
 0xe9e   :  { %1044 = vrot.lane.b32.xlu2 %v1317_v10, %s1379_s2  ;;  %v1319_v41 = vpop.eup %1318 }
 0xe9f   :  { %v999_v14 = vadd.f32 1.0, %v1319_v41 }
 0xea1   :  { %1320 = vrcp.f32 %v999_v14  ;;  %v1026_v48 = vand.u32 2147483648, %v999_v14  ;;  %vm1020_vm2 = vweird.f32 %v999_v14  ;;  %v1024_v54 = vand.u32 2147483647, %v999_v14 }
 0xea3   :  { %v1027_v28 = vor.u32 1.1754944e-38, %v1026_v48  ;;  %vm1025_vm4 = vcmp.eq.f32.partialorder %v1024_v54, 8.507059e+37 }
 0xea7   :  { %v1321_v18 = vpop.eup %1320 }
 0xea8   :  { %v1016_v49 = vmul.f32 %v1321_v18, %v999_v14  ;;  %vm1021_vm1 = vweird.f32 %v1321_v18 }
 0xea9   :  { %vm1022_vm3 = vmor %vm1020_vm2, %vm1021_vm1 }
 0xeaa   :  { %v1017_v22 = vsub.f32 1.0, %v1016_v49 }
 0xeac   :  { %v1018_v23 = vmul.f32 %v1321_v18, %v1017_v22 }
 0xeae   :  { %v1019_v24 = vadd.f32 %v1321_v18, %v1018_v23 }
 0xeb0   :  { %v1023_v27 = vsel %vm1022_vm3, %v1321_v18, %v1019_v24 }
 0xeb1   :  { %v1028_v30 = vsel %vm1025_vm4, %v1027_v28, %v1023_v27 }
 0xef8   :  { %v1045_v37 = vpop.permute.xlu2 %1044 }
 0xef9   :  { %v1047_v43 = vmul.f32 %v1045_v37, %v1028_v30 }
 0xefb   :  { %v1049_v40 = vsel %vm1048_vm5, %v1627_v60, %v1047_v43  ;;  %v1056_v50 = vsel %vm1048_vm5, %v1047_v43, %v1627_v60 }
 0xefc   :  { %1195 = vmatmul.msk.f32.vlgmr.msra.gmra.mxu0 %vm85_vm0, %v1049_v40 }
 0xf04   :  { %1196 = vmatmul.msk.f32.gmra.mxu0 %vm85_vm0, %v1050_v44 }
 0xf0c   :  { %1197 = vmatmul.msk.f32.gmra.mxu0 %vm85_vm0, %v1051_v46 }
 0xf14   :  { %1198 = vmatmul.msk.f32.gmra.mxu0 %vm85_vm0, %v1052_v47 }
 0xf1c   :  { %1199 = vmatmul.msk.f32.gmra.mxu0 %vm85_vm0, %v1053_v32 }
 0xf24   :  { %1200 = vmatmul.msk.f32.gmra.mxu0 %vm85_vm0, %v1054_v58 }
 0xf2c   :  { %1201 = vmatmul.msk.f32.gmra.mxu0 %vm85_vm0, %v1055_v35 }
 0xf34   :  { %1202 = vmatmul.msk.f32.gmra.mxu0 %vm85_vm0, %v1056_v50 }
 0xf79   :  { %v1110_v12 = vpop.f32.mrf.mxu0 }
 0xf7a   :  { %v1111_v52 = vadd.f32 %v1225_v36, %v1110_v12 }
 0xf7c   :  { %1135 = vst.msk [vmem:[%s1858_s6] sm:$0xff] %vm1134_vm6, %v1111_v52 }
 0xf81   :  { %v1113_v62 = vpop.f32.mrf.mxu0 }
 0xf82   :  { %v1114_v61 = vadd.f32 %v1225_v36, %v1113_v62 }
 0xf84   :  { %1136 = vst.msk [vmem:[%s1858_s6 + $0x8] sm:$0xff] %vm1134_vm6, %v1114_v61 }
 0xf89   :  { %v1116_v60 = vpop.f32.mrf.mxu0 }
 0xf8a   :  { %v1117_v33 = vadd.f32 %v1225_v36, %v1116_v60 }
 0xf8c   :  { %1137 = vst.msk [vmem:[%s1858_s6 + $0x10] sm:$0xff] %vm1134_vm6, %v1117_v33 }
 0xf91   :  { %v1119_v53 = vpop.f32.mrf.mxu0 }
 0xf92   :  { %v1120_v57 = vadd.f32 %v1225_v36, %v1119_v53 }
 0xf94   :  { %1138 = vst.msk [vmem:[%s1858_s6 + $0x18] sm:$0xff] %vm1134_vm6, %v1120_v57 }
 0xf99   :  { %v1122_v59 = vpop.f32.mrf.mxu0 }
 0xf9a   :  { %v1123_v5 = vadd.f32 %v1225_v36, %v1122_v59 }
 0xf9c   :  { %1139 = vst.msk [vmem:[%s1858_s6 + $0x20] sm:$0xff] %vm1134_vm6, %v1123_v5 }
 0xfa1   :  { %v1125_v7 = vpop.f32.mrf.mxu0 }
 0xfa2   :  { %v1126_v9 = vadd.f32 %v1225_v36, %v1125_v7 }
 0xfa4   :  { %1140 = vst.msk [vmem:[%s1858_s6 + $0x28] sm:$0xff] %vm1134_vm6, %v1126_v9 }
 0xfa9   :  { %v1128_v13 = vpop.f32.mrf.mxu0 }
 0xfaa   :  { %v1129_v17 = vadd.f32 %v1225_v36, %v1128_v13 }
 0xfac   :  { %1141 = vst.msk [vmem:[%s1858_s6 + $0x30] sm:$0xff] %vm1134_vm6, %v1129_v17 }
 0xfb1   :  { %v1131_v19 = vpop.f32.mrf.mxu0 }
 0xfb2   :  { %v1132_v20 = vadd.f32 %v1225_v36, %v1131_v19 }
 0xfb4   :  { %1142 = vst.msk [vmem:[%s1858_s6 + $0x38] sm:$0xff] %vm1134_vm6, %v1132_v20 }
 0xfb5   :  { %1147 = vsyncpa [#allocation4], 1 }
 0xfb6   :  { %1148 = vsyncpa [#allocation6], 1 }

</bundles_post_ra>
